<compile_context>
chip_gen: v5e
topology: v5e:2x2
jax: 0.10.0
libtpu: 0.0.40
codegen_flags: <defaults>
</compile_context>

<pallas_src>
import jax
import jax.numpy as jnp
from jax import lax
from jax.experimental import pallas as pl
from jax.experimental.pallas import tpu as pltpu


def lstm_attn_kernel(x_ref, wih_ref, b_ref,
                     whh_i_ref, whh_f_ref, whh_g_ref, whh_o_ref,
                     wa_ref, ba_ref, wo_ref, bo_ref,
                     out_ref,
                     gi_s, gf_s, gg_s, go_s, h_hist):
    # x_ref:  (T*Bp, C)   time-major, batch-padded, flattened
    # wih:    (C, 4H)     b: (1, 4H)   (b = b_ih + b_hh, folded into the pre-pass)
    # whh_*:  (H, H)      one per gate (i, f, g, o)
    # wa:     (H, H)      ba: (1, H)
    # wo:     (1, H)      bo: (1, 1)
    # out:    (Bp, 1)
    # scratch gi/gf/gg/go/h_hist: (T*Bp, H) f32 VMEM
    H = wa_ref.shape[0]
    Bp = out_ref.shape[0]
    T = x_ref.shape[0] // Bp

    # ---- Pre-pass: input projection for ALL timesteps as ONE MXU matmul ------
    gates = jnp.dot(x_ref[...], wih_ref[...],
                    preferred_element_type=jnp.float32) + b_ref[...]     # (T*Bp, 4H)
    gi_s[...] = gates[:, 0 * H:1 * H]
    gf_s[...] = gates[:, 1 * H:2 * H]
    gg_s[...] = gates[:, 2 * H:3 * H]
    go_s[...] = gates[:, 3 * H:4 * H]

    # Hoist recurrent weights out of the time loop.
    whh_i = whh_i_ref[...]
    whh_f = whh_f_ref[...]
    whh_g = whh_g_ref[...]
    whh_o = whh_o_ref[...]

    # ---- Recurrence: only h @ W_hh_* per step, fully unrolled ---------------
    def step(t, carry):
        h, c = carry
        off = pl.multiple_of(t * Bp, Bp)                    # sublane-aligned row offset
        i = jax.nn.sigmoid(gi_s[pl.ds(off, Bp), :] +
                           jnp.dot(h, whh_i, preferred_element_type=jnp.float32))
        f = jax.nn.sigmoid(gf_s[pl.ds(off, Bp), :] +
                           jnp.dot(h, whh_f, preferred_element_type=jnp.float32))
        g = jnp.tanh(gg_s[pl.ds(off, Bp), :] +
                     jnp.dot(h, whh_g, preferred_element_type=jnp.float32))
        o = jax.nn.sigmoid(go_s[pl.ds(off, Bp), :] +
                           jnp.dot(h, whh_o, preferred_element_type=jnp.float32))
        c = f * c + i * g
        h = o * jnp.tanh(c)
        h_hist[pl.ds(off, Bp), :] = h                       # keep history for attention
        return h, c

    h0 = jnp.zeros((Bp, H), jnp.float32)
    c0 = jnp.zeros((Bp, H), jnp.float32)
    lax.fori_loop(0, T, step, (h0, c0), unroll=True)

    # ---- Attention: one batched matmul + vectorized softmax over features ----
    h_all = h_hist[...]                                                   # (T*Bp, H)
    a = jnp.maximum(jnp.dot(h_all, wa_ref[...],
                            preferred_element_type=jnp.float32) + ba_ref[...], 0.0)
    a = a - jnp.max(a, axis=-1, keepdims=True)
    e = jnp.exp(a)
    s = jnp.sum(e, axis=-1, keepdims=True)
    inv = pl.reciprocal(s, approx=True)                     # EUP reciprocal (free slot)
    inv = inv * (2.0 - s * inv)                             # one Newton step -> f32 accuracy
    weighted = h_all * (e * inv)                                          # (T*Bp, H)

    # Sum over time (static slices, unrolled): att[b] = sum_t weighted[t*Bp + b]
    att = weighted[0:Bp, :]
    for t in range(1, T):
        att = att + weighted[t * Bp:(t + 1) * Bp, :]

    # ---- Output head: ReLU + (H -> 1) projection on the VPU (no N=1 MXU) -----
    r = jnp.maximum(att, 0.0)                                             # (Bp, H)
    y = jnp.sum(r * wo_ref[...], axis=-1, keepdims=True) + bo_ref[...]    # (Bp, 1)
    out_ref[...] = y.astype(out_ref.dtype)


def lstm_with_attention(x, params):
    """x: (B, T, C) float32 -> (B,) float32."""
    B, T, C = x.shape
    H = params["w_att"].shape[0]
    Bp = max(8, ((B + 7) // 8) * 8)                 # pad batch to f32 sublane granule

    # Zero-pad batch, go time-major, flatten to (T*Bp, C) for the big matmul.
    x_p = jnp.zeros((Bp, T, C), x.dtype).at[:B].set(x)
    x_flat = jnp.transpose(x_p, (1, 0, 2)).reshape(T * Bp, C)

    wih = params["w_ih"]                                        # (C, 4H)
    b = (params["b_ih"] + params["b_hh"]).reshape(1, 4 * H)     # folded LSTM bias
    whh = params["w_hh"]                                        # (H, 4H)
    whh_i = whh[:, 0 * H:1 * H]
    whh_f = whh[:, 1 * H:2 * H]
    whh_g = whh[:, 2 * H:3 * H]
    whh_o = whh[:, 3 * H:4 * H]
    wa = params["w_att"]                                        # (H, H)
    ba = params["b_att"].reshape(1, H)
    wo = params["w_out"].reshape(1, H)                          # row vector for VPU reduce
    bo = params["b_out"].reshape(1, 1)

    vmem = pl.BlockSpec(memory_space=pltpu.MemorySpace.VMEM)
    out = pl.pallas_call(
        lstm_attn_kernel,
        out_shape=jax.ShapeDtypeStruct((Bp, 1), jnp.float32),
        in_specs=[vmem] * 11,
        out_specs=vmem,
        scratch_shapes=[pltpu.VMEM((T * Bp, H), jnp.float32)] * 5,
    )(x_flat, wih, b, whh_i, whh_f, whh_g, whh_o, wa, ba, wo, bo)
    return out[:B, 0]


def init_params(key, input_size, hidden_size):
    """Deterministic parameter init with PyTorch-equivalent shapes (transposed)."""
    ks = jax.random.split(key, 8)
    s = 1.0 / jnp.sqrt(hidden_size)
    H, C = hidden_size, input_size
    return {
        # nn.LSTM: weight_ih_l0 (4H, C) -> stored transposed (C, 4H)
        "w_ih": jax.random.uniform(ks[0], (C, 4 * H), jnp.float32, -s, s),
        "w_hh": jax.random.uniform(ks[1], (H, 4 * H), jnp.float32, -s, s),
        "b_ih": jax.random.uniform(ks[2], (4 * H,), jnp.float32, -s, s),
        "b_hh": jax.random.uniform(ks[3], (4 * H,), jnp.float32, -s, s),
        # att_weight_layer Linear(H, H) -> stored transposed (H, H)
        "w_att": jax.random.uniform(ks[4], (H, H), jnp.float32, -s, s),
        "b_att": jax.random.uniform(ks[5], (H,), jnp.float32, -s, s),
        # output_layer Linear(H, 1) -> stored transposed (H, 1)
        "w_out": jax.random.uniform(ks[6], (H, 1), jnp.float32, -s, s),
        "b_out": jax.random.uniform(ks[7], (1,), jnp.float32, -s, s),
    }


def reference_forward(x, p):
    """Pure-JAX reference mirroring the PyTorch forward."""
    B, T, C = x.shape
    H = p["w_hh"].shape[1] // 4
    b = p["b_ih"] + p["b_hh"]

    def step(carry, x_t):
        h, c = carry
        g = x_t @ p["w_ih"] + h @ p["w_hh"] + b
        i = jax.nn.sigmoid(g[:, 0 * H:1 * H])
        f = jax.nn.sigmoid(g[:, 1 * H:2 * H])
        gg = jnp.tanh(g[:, 2 * H:3 * H])
        o = jax.nn.sigmoid(g[:, 3 * H:4 * H])
        c = f * c + i * gg
        h = o * jnp.tanh(c)
        return (h, c), h

    h0 = jnp.zeros((B, H), jnp.float32)
    c0 = jnp.zeros((B, H), jnp.float32)
    _, hs = lax.scan(step, (h0, c0), jnp.transpose(x, (1, 0, 2)))
    out = jnp.transpose(hs, (1, 0, 2))                                    # (B, T, H)
    att = jax.nn.softmax(jnp.maximum(out @ p["w_att"] + p["b_att"], 0.0), axis=-1)
    att_sum = jnp.sum(out * att, axis=1)                                  # (B, H)
    return (jnp.maximum(att_sum, 0.0) @ p["w_out"] + p["b_out"])[:, 0]


if __name__ == "__main__":
    B, T, C, H = 2, 8, 16, 32
    key = jax.random.PRNGKey(0)
    kx, kp = jax.random.split(key)
    x = jax.random.normal(kx, (B, T, C), jnp.float32)
    params = init_params(kp, C, H)

    y = jax.block_until_ready(jax.jit(lstm_with_attention)(x, params))
    y_ref = reference_forward(x, params)
    assert y.shape == (B,)
    # Tolerance covers the Newton-refined EUP approximate reciprocal in the softmax.
    assert jnp.allclose(y, y_ref, atol=1e-4, rtol=1e-4), (y, y_ref)
    print("KERNEL_OK")
</pallas_src>

<mosaic_0001>
module attributes {stable_mosaic.version = 11 : i64} {
  func.func @lstm_attn_kernel(%arg0: memref<64x16xf32, #tpu.memory_space<vmem>>, %arg1: memref<16x128xf32, #tpu.memory_space<vmem>>, %arg2: memref<1x128xf32, #tpu.memory_space<vmem>>, %arg3: memref<32x32xf32, #tpu.memory_space<vmem>>, %arg4: memref<32x32xf32, #tpu.memory_space<vmem>>, %arg5: memref<32x32xf32, #tpu.memory_space<vmem>>, %arg6: memref<32x32xf32, #tpu.memory_space<vmem>>, %arg7: memref<32x32xf32, #tpu.memory_space<vmem>>, %arg8: memref<1x32xf32, #tpu.memory_space<vmem>>, %arg9: memref<1x32xf32, #tpu.memory_space<vmem>>, %arg10: memref<1x1xf32, #tpu.memory_space<vmem>>, %arg11: memref<8x1xf32, #tpu.memory_space<vmem>>, %arg12: memref<64x32xf32, #tpu.memory_space<vmem>>, %arg13: memref<64x32xf32, #tpu.memory_space<vmem>>, %arg14: memref<64x32xf32, #tpu.memory_space<vmem>>, %arg15: memref<64x32xf32, #tpu.memory_space<vmem>>, %arg16: memref<64x32xf32, #tpu.memory_space<vmem>>) attributes {dimension_semantics = [], scalar_prefetch = 0 : i64, scratch_operands = 5 : i64, tpu.core_type = #tpu.core_type<tc>} {
    %c0 = arith.constant 0 : index
    %c0_0 = arith.constant 0 : index
    %0 = vector.load %arg0[%c0, %c0_0] : memref<64x16xf32, #tpu.memory_space<vmem>>, vector<64x16xf32>
    %c0_1 = arith.constant 0 : index
    %c0_2 = arith.constant 0 : index
    %1 = vector.load %arg1[%c0_1, %c0_2] : memref<16x128xf32, #tpu.memory_space<vmem>>, vector<16x128xf32>
    %cst = arith.constant dense<0.000000e+00> : vector<64x128xf32>
    %2 = tpu.matmul %0, %1, %cst {dimension_numbers = #tpu.dot_dimension_numbers<[1], [0], [0], [1], [0, 0, 1, 1], [], []>} : vector<64x16xf32>, vector<16x128xf32>, vector<64x128xf32> -> vector<64x128xf32>
    %c0_3 = arith.constant 0 : index
    %c0_4 = arith.constant 0 : index
    %3 = vector.load %arg2[%c0_3, %c0_4] : memref<1x128xf32, #tpu.memory_space<vmem>>, vector<1x128xf32>
    %4 = vector.broadcast %3 : vector<1x128xf32> to vector<64x128xf32>
    %5 = arith.addf %2, %4 : vector<64x128xf32>
    %6 = vector.extract_strided_slice %5 {offsets = [0, 0], sizes = [64, 32], strides = [1, 1]} : vector<64x128xf32> to vector<64x32xf32>
    %c0_5 = arith.constant 0 : index
    %c0_6 = arith.constant 0 : index
    %7 = vector.load %arg12[%c0_5, %c0_6] : memref<64x32xf32, #tpu.memory_space<vmem>>, vector<64x32xf32>
    tpu.vector_store %arg12[%c0_5, %c0_6], %6 {strides = array<i32>} : memref<64x32xf32, #tpu.memory_space<vmem>>, vector<64x32xf32>,
    %8 = vector.extract_strided_slice %5 {offsets = [0, 32], sizes = [64, 32], strides = [1, 1]} : vector<64x128xf32> to vector<64x32xf32>
    %c0_7 = arith.constant 0 : index
    %c0_8 = arith.constant 0 : index
    %9 = vector.load %arg13[%c0_7, %c0_8] : memref<64x32xf32, #tpu.memory_space<vmem>>, vector<64x32xf32>
    tpu.vector_store %arg13[%c0_7, %c0_8], %8 {strides = array<i32>} : memref<64x32xf32, #tpu.memory_space<vmem>>, vector<64x32xf32>,
    %10 = vector.extract_strided_slice %5 {offsets = [0, 64], sizes = [64, 32], strides = [1, 1]} : vector<64x128xf32> to vector<64x32xf32>
    %c0_9 = arith.constant 0 : index
    %c0_10 = arith.constant 0 : index
    %11 = vector.load %arg14[%c0_9, %c0_10] : memref<64x32xf32, #tpu.memory_space<vmem>>, vector<64x32xf32>
    tpu.vector_store %arg14[%c0_9, %c0_10], %10 {strides = array<i32>} : memref<64x32xf32, #tpu.memory_space<vmem>>, vector<64x32xf32>,
    %12 = vector.extract_strided_slice %5 {offsets = [0, 96], sizes = [64, 32], strides = [1, 1]} : vector<64x128xf32> to vector<64x32xf32>
    %c0_11 = arith.constant 0 : index
    %c0_12 = arith.constant 0 : index
    %13 = vector.load %arg15[%c0_11, %c0_12] : memref<64x32xf32, #tpu.memory_space<vmem>>, vector<64x32xf32>
    tpu.vector_store %arg15[%c0_11, %c0_12], %12 {strides = array<i32>} : memref<64x32xf32, #tpu.memory_space<vmem>>, vector<64x32xf32>,
    %c0_13 = arith.constant 0 : index
    %c0_14 = arith.constant 0 : index
    %14 = vector.load %arg3[%c0_13, %c0_14] : memref<32x32xf32, #tpu.memory_space<vmem>>, vector<32x32xf32>
    %c0_15 = arith.constant 0 : index
    %c0_16 = arith.constant 0 : index
    %15 = vector.load %arg4[%c0_15, %c0_16] : memref<32x32xf32, #tpu.memory_space<vmem>>, vector<32x32xf32>
    %c0_17 = arith.constant 0 : index
    %c0_18 = arith.constant 0 : index
    %16 = vector.load %arg5[%c0_17, %c0_18] : memref<32x32xf32, #tpu.memory_space<vmem>>, vector<32x32xf32>
    %c0_19 = arith.constant 0 : index
    %c0_20 = arith.constant 0 : index
    %17 = vector.load %arg6[%c0_19, %c0_20] : memref<32x32xf32, #tpu.memory_space<vmem>>, vector<32x32xf32>
    %cst_21 = arith.constant 0.000000e+00 : f32
    %18 = vector.broadcast %cst_21 : f32 to vector<8x32xf32>
    %cst_22 = arith.constant 0.000000e+00 : f32
    %19 = vector.broadcast %cst_22 : f32 to vector<8x32xf32>
    %c0_i32 = arith.constant 0 : i32
    %c8_i32 = arith.constant 8 : i32
    %20 = arith.muli %c0_i32, %c8_i32 : i32
    %21 = tpu.assume_multiple %20, 8 : i32
    %22 = arith.index_cast %21 : i32 to index
    %c0_23 = arith.constant 0 : index
    %23 = vector.load %arg12[%22, %c0_23] : memref<64x32xf32, #tpu.memory_space<vmem>>, vector<8x32xf32>
    %cst_24 = arith.constant dense<0.000000e+00> : vector<8x32xf32>
    %24 = tpu.matmul %18, %14, %cst_24 {dimension_numbers = #tpu.dot_dimension_numbers<[1], [0], [0], [1], [0, 0, 1, 1], [], []>} : vector<8x32xf32>, vector<32x32xf32>, vector<8x32xf32> -> vector<8x32xf32>
    %25 = arith.addf %23, %24 : vector<8x32xf32>
    %26 = arith.negf %25 : vector<8x32xf32>
    %27 = math.exp %26 : vector<8x32xf32>
    %cst_25 = arith.constant 1.000000e+00 : f32
    %28 = vector.broadcast %cst_25 : f32 to vector<8x32xf32>
    %29 = arith.addf %28, %27 : vector<8x32xf32>
    %30 = arith.divf %28, %29 : vector<8x32xf32>
    %31 = arith.index_cast %21 : i32 to index
    %c0_26 = arith.constant 0 : index
    %32 = vector.load %arg13[%31, %c0_26] : memref<64x32xf32, #tpu.memory_space<vmem>>, vector<8x32xf32>
    %cst_27 = arith.constant dense<0.000000e+00> : vector<8x32xf32>
    %33 = tpu.matmul %18, %15, %cst_27 {dimension_numbers = #tpu.dot_dimension_numbers<[1], [0], [0], [1], [0, 0, 1, 1], [], []>} : vector<8x32xf32>, vector<32x32xf32>, vector<8x32xf32> -> vector<8x32xf32>
    %34 = arith.addf %32, %33 : vector<8x32xf32>
    %35 = arith.negf %34 : vector<8x32xf32>
    %36 = math.exp %35 : vector<8x32xf32>
    %cst_28 = arith.constant 1.000000e+00 : f32
    %37 = vector.broadcast %cst_28 : f32 to vector<8x32xf32>
    %38 = arith.addf %37, %36 : vector<8x32xf32>
    %39 = arith.divf %37, %38 : vector<8x32xf32>
    %40 = arith.index_cast %21 : i32 to index
    %c0_29 = arith.constant 0 : index
    %41 = vector.load %arg14[%40, %c0_29] : memref<64x32xf32, #tpu.memory_space<vmem>>, vector<8x32xf32>
    %cst_30 = arith.constant dense<0.000000e+00> : vector<8x32xf32>
    %42 = tpu.matmul %18, %16, %cst_30 {dimension_numbers = #tpu.dot_dimension_numbers<[1], [0], [0], [1], [0, 0, 1, 1], [], []>} : vector<8x32xf32>, vector<32x32xf32>, vector<8x32xf32> -> vector<8x32xf32>
    %43 = arith.addf %41, %42 : vector<8x32xf32>
    %44 = math.tanh %43 : vector<8x32xf32>
    %45 = arith.index_cast %21 : i32 to index
    %c0_31 = arith.constant 0 : index
    %46 = vector.load %arg15[%45, %c0_31] : memref<64x32xf32, #tpu.memory_space<vmem>>, vector<8x32xf32>
    %cst_32 = arith.constant dense<0.000000e+00> : vector<8x32xf32>
    %47 = tpu.matmul %18, %17, %cst_32 {dimension_numbers = #tpu.dot_dimension_numbers<[1], [0], [0], [1], [0, 0, 1, 1], [], []>} : vector<8x32xf32>, vector<32x32xf32>, vector<8x32xf32> -> vector<8x32xf32>
    %48 = arith.addf %46, %47 : vector<8x32xf32>
    %49 = arith.negf %48 : vector<8x32xf32>
    %50 = math.exp %49 : vector<8x32xf32>
    %cst_33 = arith.constant 1.000000e+00 : f32
    %51 = vector.broadcast %cst_33 : f32 to vector<8x32xf32>
    %52 = arith.addf %51, %50 : vector<8x32xf32>
    %53 = arith.divf %51, %52 : vector<8x32xf32>
    %54 = arith.mulf %39, %19 : vector<8x32xf32>
    %55 = arith.mulf %30, %44 : vector<8x32xf32>
    %56 = arith.addf %54, %55 : vector<8x32xf32>
    %57 = math.tanh %56 : vector<8x32xf32>
    %58 = arith.mulf %53, %57 : vector<8x32xf32>
    %59 = arith.index_cast %21 : i32 to index
    %c0_34 = arith.constant 0 : index
    %60 = vector.load %arg16[%59, %c0_34] : memref<64x32xf32, #tpu.memory_space<vmem>>, vector<8x32xf32>
    tpu.vector_store %arg16[%59, %c0_34], %58 {strides = array<i32>} : memref<64x32xf32, #tpu.memory_space<vmem>>, vector<8x32xf32>,
    %c1_i32 = arith.constant 1 : i32
    %c8_i32_35 = arith.constant 8 : i32
    %61 = arith.muli %c1_i32, %c8_i32_35 : i32
    %62 = tpu.assume_multiple %61, 8 : i32
    %63 = arith.index_cast %62 : i32 to index
    %c0_36 = arith.constant 0 : index
    %64 = vector.load %arg12[%63, %c0_36] : memref<64x32xf32, #tpu.memory_space<vmem>>, vector<8x32xf32>
    %cst_37 = arith.constant dense<0.000000e+00> : vector<8x32xf32>
    %65 = tpu.matmul %58, %14, %cst_37 {dimension_numbers = #tpu.dot_dimension_numbers<[1], [0], [0], [1], [0, 0, 1, 1], [], []>} : vector<8x32xf32>, vector<32x32xf32>, vector<8x32xf32> -> vector<8x32xf32>
    %66 = arith.addf %64, %65 : vector<8x32xf32>
    %67 = arith.negf %66 : vector<8x32xf32>
    %68 = math.exp %67 : vector<8x32xf32>
    %cst_38 = arith.constant 1.000000e+00 : f32
    %69 = vector.broadcast %cst_38 : f32 to vector<8x32xf32>
    %70 = arith.addf %69, %68 : vector<8x32xf32>
    %71 = arith.divf %69, %70 : vector<8x32xf32>
    %72 = arith.index_cast %62 : i32 to index
    %c0_39 = arith.constant 0 : index
    %73 = vector.load %arg13[%72, %c0_39] : memref<64x32xf32, #tpu.memory_space<vmem>>, vector<8x32xf32>
    %cst_40 = arith.constant dense<0.000000e+00> : vector<8x32xf32>
    %74 = tpu.matmul %58, %15, %cst_40 {dimension_numbers = #tpu.dot_dimension_numbers<[1], [0], [0], [1], [0, 0, 1, 1], [], []>} : vector<8x32xf32>, vector<32x32xf32>, vector<8x32xf32> -> vector<8x32xf32>
    %75 = arith.addf %73, %74 : vector<8x32xf32>
    %76 = arith.negf %75 : vector<8x32xf32>
    %77 = math.exp %76 : vector<8x32xf32>
    %cst_41 = arith.constant 1.000000e+00 : f32
    %78 = vector.broadcast %cst_41 : f32 to vector<8x32xf32>
    %79 = arith.addf %78, %77 : vector<8x32xf32>
    %80 = arith.divf %78, %79 : vector<8x32xf32>
    %81 = arith.index_cast %62 : i32 to index
    %c0_42 = arith.constant 0 : index
    %82 = vector.load %arg14[%81, %c0_42] : memref<64x32xf32, #tpu.memory_space<vmem>>, vector<8x32xf32>
    %cst_43 = arith.constant dense<0.000000e+00> : vector<8x32xf32>
    %83 = tpu.matmul %58, %16, %cst_43 {dimension_numbers = #tpu.dot_dimension_numbers<[1], [0], [0], [1], [0, 0, 1, 1], [], []>} : vector<8x32xf32>, vector<32x32xf32>, vector<8x32xf32> -> vector<8x32xf32>
    %84 = arith.addf %82, %83 : vector<8x32xf32>
    %85 = math.tanh %84 : vector<8x32xf32>
    %86 = arith.index_cast %62 : i32 to index
    %c0_44 = arith.constant 0 : index
    %87 = vector.load %arg15[%86, %c0_44] : memref<64x32xf32, #tpu.memory_space<vmem>>, vector<8x32xf32>
    %cst_45 = arith.constant dense<0.000000e+00> : vector<8x32xf32>
    %88 = tpu.matmul %58, %17, %cst_45 {dimension_numbers = #tpu.dot_dimension_numbers<[1], [0], [0], [1], [0, 0, 1, 1], [], []>} : vector<8x32xf32>, vector<32x32xf32>, vector<8x32xf32> -> vector<8x32xf32>
    %89 = arith.addf %87, %88 : vector<8x32xf32>
    %90 = arith.negf %89 : vector<8x32xf32>
    %91 = math.exp %90 : vector<8x32xf32>
    %cst_46 = arith.constant 1.000000e+00 : f32
    %92 = vector.broadcast %cst_46 : f32 to vector<8x32xf32>
    %93 = arith.addf %92, %91 : vector<8x32xf32>
    %94 = arith.divf %92, %93 : vector<8x32xf32>
    %95 = arith.mulf %80, %56 : vector<8x32xf32>
    %96 = arith.mulf %71, %85 : vector<8x32xf32>
    %97 = arith.addf %95, %96 : vector<8x32xf32>
    %98 = math.tanh %97 : vector<8x32xf32>
    %99 = arith.mulf %94, %98 : vector<8x32xf32>
    %100 = arith.index_cast %62 : i32 to index
    %c0_47 = arith.constant 0 : index
    %101 = vector.load %arg16[%100, %c0_47] : memref<64x32xf32, #tpu.memory_space<vmem>>, vector<8x32xf32>
    tpu.vector_store %arg16[%100, %c0_47], %99 {strides = array<i32>} : memref<64x32xf32, #tpu.memory_space<vmem>>, vector<8x32xf32>,
    %c2_i32 = arith.constant 2 : i32
    %c8_i32_48 = arith.constant 8 : i32
    %102 = arith.muli %c2_i32, %c8_i32_48 : i32
    %103 = tpu.assume_multiple %102, 8 : i32
    %104 = arith.index_cast %103 : i32 to index
    %c0_49 = arith.constant 0 : index
    %105 = vector.load %arg12[%104, %c0_49] : memref<64x32xf32, #tpu.memory_space<vmem>>, vector<8x32xf32>
    %cst_50 = arith.constant dense<0.000000e+00> : vector<8x32xf32>
    %106 = tpu.matmul %99, %14, %cst_50 {dimension_numbers = #tpu.dot_dimension_numbers<[1], [0], [0], [1], [0, 0, 1, 1], [], []>} : vector<8x32xf32>, vector<32x32xf32>, vector<8x32xf32> -> vector<8x32xf32>
    %107 = arith.addf %105, %106 : vector<8x32xf32>
    %108 = arith.negf %107 : vector<8x32xf32>
    %109 = math.exp %108 : vector<8x32xf32>
    %cst_51 = arith.constant 1.000000e+00 : f32
    %110 = vector.broadcast %cst_51 : f32 to vector<8x32xf32>
    %111 = arith.addf %110, %109 : vector<8x32xf32>
    %112 = arith.divf %110, %111 : vector<8x32xf32>
    %113 = arith.index_cast %103 : i32 to index
    %c0_52 = arith.constant 0 : index
    %114 = vector.load %arg13[%113, %c0_52] : memref<64x32xf32, #tpu.memory_space<vmem>>, vector<8x32xf32>
    %cst_53 = arith.constant dense<0.000000e+00> : vector<8x32xf32>
    %115 = tpu.matmul %99, %15, %cst_53 {dimension_numbers = #tpu.dot_dimension_numbers<[1], [0], [0], [1], [0, 0, 1, 1], [], []>} : vector<8x32xf32>, vector<32x32xf32>, vector<8x32xf32> -> vector<8x32xf32>
    %116 = arith.addf %114, %115 : vector<8x32xf32>
    %117 = arith.negf %116 : vector<8x32xf32>
    %118 = math.exp %117 : vector<8x32xf32>
    %cst_54 = arith.constant 1.000000e+00 : f32
    %119 = vector.broadcast %cst_54 : f32 to vector<8x32xf32>
    %120 = arith.addf %119, %118 : vector<8x32xf32>
    %121 = arith.divf %119, %120 : vector<8x32xf32>
    %122 = arith.index_cast %103 : i32 to index
    %c0_55 = arith.constant 0 : index
    %123 = vector.load %arg14[%122, %c0_55] : memref<64x32xf32, #tpu.memory_space<vmem>>, vector<8x32xf32>
    %cst_56 = arith.constant dense<0.000000e+00> : vector<8x32xf32>
    %124 = tpu.matmul %99, %16, %cst_56 {dimension_numbers = #tpu.dot_dimension_numbers<[1], [0], [0], [1], [0, 0, 1, 1], [], []>} : vector<8x32xf32>, vector<32x32xf32>, vector<8x32xf32> -> vector<8x32xf32>
    %125 = arith.addf %123, %124 : vector<8x32xf32>
    %126 = math.tanh %125 : vector<8x32xf32>
    %127 = arith.index_cast %103 : i32 to index
    %c0_57 = arith.constant 0 : index
    %128 = vector.load %arg15[%127, %c0_57] : memref<64x32xf32, #tpu.memory_space<vmem>>, vector<8x32xf32>
    %cst_58 = arith.constant dense<0.000000e+00> : vector<8x32xf32>
    %129 = tpu.matmul %99, %17, %cst_58 {dimension_numbers = #tpu.dot_dimension_numbers<[1], [0], [0], [1], [0, 0, 1, 1], [], []>} : vector<8x32xf32>, vector<32x32xf32>, vector<8x32xf32> -> vector<8x32xf32>
    %130 = arith.addf %128, %129 : vector<8x32xf32>
    %131 = arith.negf %130 : vector<8x32xf32>
    %132 = math.exp %131 : vector<8x32xf32>
    %cst_59 = arith.constant 1.000000e+00 : f32
    %133 = vector.broadcast %cst_59 : f32 to vector<8x32xf32>
    %134 = arith.addf %133, %132 : vector<8x32xf32>
    %135 = arith.divf %133, %134 : vector<8x32xf32>
    %136 = arith.mulf %121, %97 : vector<8x32xf32>
    %137 = arith.mulf %112, %126 : vector<8x32xf32>
    %138 = arith.addf %136, %137 : vector<8x32xf32>
    %139 = math.tanh %138 : vector<8x32xf32>
    %140 = arith.mulf %135, %139 : vector<8x32xf32>
    %141 = arith.index_cast %103 : i32 to index
    %c0_60 = arith.constant 0 : index
    %142 = vector.load %arg16[%141, %c0_60] : memref<64x32xf32, #tpu.memory_space<vmem>>, vector<8x32xf32>
    tpu.vector_store %arg16[%141, %c0_60], %140 {strides = array<i32>} : memref<64x32xf32, #tpu.memory_space<vmem>>, vector<8x32xf32>,
    %c3_i32 = arith.constant 3 : i32
    %c8_i32_61 = arith.constant 8 : i32
    %143 = arith.muli %c3_i32, %c8_i32_61 : i32
    %144 = tpu.assume_multiple %143, 8 : i32
    %145 = arith.index_cast %144 : i32 to index
    %c0_62 = arith.constant 0 : index
    %146 = vector.load %arg12[%145, %c0_62] : memref<64x32xf32, #tpu.memory_space<vmem>>, vector<8x32xf32>
    %cst_63 = arith.constant dense<0.000000e+00> : vector<8x32xf32>
    %147 = tpu.matmul %140, %14, %cst_63 {dimension_numbers = #tpu.dot_dimension_numbers<[1], [0], [0], [1], [0, 0, 1, 1], [], []>} : vector<8x32xf32>, vector<32x32xf32>, vector<8x32xf32> -> vector<8x32xf32>
    %148 = arith.addf %146, %147 : vector<8x32xf32>
    %149 = arith.negf %148 : vector<8x32xf32>
    %150 = math.exp %149 : vector<8x32xf32>
    %cst_64 = arith.constant 1.000000e+00 : f32
    %151 = vector.broadcast %cst_64 : f32 to vector<8x32xf32>
    %152 = arith.addf %151, %150 : vector<8x32xf32>
    %153 = arith.divf %151, %152 : vector<8x32xf32>
    %154 = arith.index_cast %144 : i32 to index
    %c0_65 = arith.constant 0 : index
    %155 = vector.load %arg13[%154, %c0_65] : memref<64x32xf32, #tpu.memory_space<vmem>>, vector<8x32xf32>
    %cst_66 = arith.constant dense<0.000000e+00> : vector<8x32xf32>
    %156 = tpu.matmul %140, %15, %cst_66 {dimension_numbers = #tpu.dot_dimension_numbers<[1], [0], [0], [1], [0, 0, 1, 1], [], []>} : vector<8x32xf32>, vector<32x32xf32>, vector<8x32xf32> -> vector<8x32xf32>
    %157 = arith.addf %155, %156 : vector<8x32xf32>
    %158 = arith.negf %157 : vector<8x32xf32>
    %159 = math.exp %158 : vector<8x32xf32>
    %cst_67 = arith.constant 1.000000e+00 : f32
    %160 = vector.broadcast %cst_67 : f32 to vector<8x32xf32>
    %161 = arith.addf %160, %159 : vector<8x32xf32>
    %162 = arith.divf %160, %161 : vector<8x32xf32>
    %163 = arith.index_cast %144 : i32 to index
    %c0_68 = arith.constant 0 : index
    %164 = vector.load %arg14[%163, %c0_68] : memref<64x32xf32, #tpu.memory_space<vmem>>, vector<8x32xf32>
    %cst_69 = arith.constant dense<0.000000e+00> : vector<8x32xf32>
    %165 = tpu.matmul %140, %16, %cst_69 {dimension_numbers = #tpu.dot_dimension_numbers<[1], [0], [0], [1], [0, 0, 1, 1], [], []>} : vector<8x32xf32>, vector<32x32xf32>, vector<8x32xf32> -> vector<8x32xf32>
    %166 = arith.addf %164, %165 : vector<8x32xf32>
    %167 = math.tanh %166 : vector<8x32xf32>
    %168 = arith.index_cast %144 : i32 to index
    %c0_70 = arith.constant 0 : index
    %169 = vector.load %arg15[%168, %c0_70] : memref<64x32xf32, #tpu.memory_space<vmem>>, vector<8x32xf32>
    %cst_71 = arith.constant dense<0.000000e+00> : vector<8x32xf32>
    %170 = tpu.matmul %140, %17, %cst_71 {dimension_numbers = #tpu.dot_dimension_numbers<[1], [0], [0], [1], [0, 0, 1, 1], [], []>} : vector<8x32xf32>, vector<32x32xf32>, vector<8x32xf32> -> vector<8x32xf32>
    %171 = arith.addf %169, %170 : vector<8x32xf32>
    %172 = arith.negf %171 : vector<8x32xf32>
    %173 = math.exp %172 : vector<8x32xf32>
    %cst_72 = arith.constant 1.000000e+00 : f32
    %174 = vector.broadcast %cst_72 : f32 to vector<8x32xf32>
    %175 = arith.addf %174, %173 : vector<8x32xf32>
    %176 = arith.divf %174, %175 : vector<8x32xf32>
    %177 = arith.mulf %162, %138 : vector<8x32xf32>
    %178 = arith.mulf %153, %167 : vector<8x32xf32>
    %179 = arith.addf %177, %178 : vector<8x32xf32>
    %180 = math.tanh %179 : vector<8x32xf32>
    %181 = arith.mulf %176, %180 : vector<8x32xf32>
    %182 = arith.index_cast %144 : i32 to index
    %c0_73 = arith.constant 0 : index
    %183 = vector.load %arg16[%182, %c0_73] : memref<64x32xf32, #tpu.memory_space<vmem>>, vector<8x32xf32>
    tpu.vector_store %arg16[%182, %c0_73], %181 {strides = array<i32>} : memref<64x32xf32, #tpu.memory_space<vmem>>, vector<8x32xf32>,
    %c4_i32 = arith.constant 4 : i32
    %c8_i32_74 = arith.constant 8 : i32
    %184 = arith.muli %c4_i32, %c8_i32_74 : i32
    %185 = tpu.assume_multiple %184, 8 : i32
    %186 = arith.index_cast %185 : i32 to index
    %c0_75 = arith.constant 0 : index
    %187 = vector.load %arg12[%186, %c0_75] : memref<64x32xf32, #tpu.memory_space<vmem>>, vector<8x32xf32>
    %cst_76 = arith.constant dense<0.000000e+00> : vector<8x32xf32>
    %188 = tpu.matmul %181, %14, %cst_76 {dimension_numbers = #tpu.dot_dimension_numbers<[1], [0], [0], [1], [0, 0, 1, 1], [], []>} : vector<8x32xf32>, vector<32x32xf32>, vector<8x32xf32> -> vector<8x32xf32>
    %189 = arith.addf %187, %188 : vector<8x32xf32>
    %190 = arith.negf %189 : vector<8x32xf32>
    %191 = math.exp %190 : vector<8x32xf32>
    %cst_77 = arith.constant 1.000000e+00 : f32
    %192 = vector.broadcast %cst_77 : f32 to vector<8x32xf32>
    %193 = arith.addf %192, %191 : vector<8x32xf32>
    %194 = arith.divf %192, %193 : vector<8x32xf32>
    %195 = arith.index_cast %185 : i32 to index
    %c0_78 = arith.constant 0 : index
    %196 = vector.load %arg13[%195, %c0_78] : memref<64x32xf32, #tpu.memory_space<vmem>>, vector<8x32xf32>
    %cst_79 = arith.constant dense<0.000000e+00> : vector<8x32xf32>
    %197 = tpu.matmul %181, %15, %cst_79 {dimension_numbers = #tpu.dot_dimension_numbers<[1], [0], [0], [1], [0, 0, 1, 1], [], []>} : vector<8x32xf32>, vector<32x32xf32>, vector<8x32xf32> -> vector<8x32xf32>
    %198 = arith.addf %196, %197 : vector<8x32xf32>
    %199 = arith.negf %198 : vector<8x32xf32>
    %200 = math.exp %199 : vector<8x32xf32>
    %cst_80 = arith.constant 1.000000e+00 : f32
    %201 = vector.broadcast %cst_80 : f32 to vector<8x32xf32>
    %202 = arith.addf %201, %200 : vector<8x32xf32>
    %203 = arith.divf %201, %202 : vector<8x32xf32>
    %204 = arith.index_cast %185 : i32 to index
    %c0_81 = arith.constant 0 : index
    %205 = vector.load %arg14[%204, %c0_81] : memref<64x32xf32, #tpu.memory_space<vmem>>, vector<8x32xf32>
    %cst_82 = arith.constant dense<0.000000e+00> : vector<8x32xf32>
    %206 = tpu.matmul %181, %16, %cst_82 {dimension_numbers = #tpu.dot_dimension_numbers<[1], [0], [0], [1], [0, 0, 1, 1], [], []>} : vector<8x32xf32>, vector<32x32xf32>, vector<8x32xf32> -> vector<8x32xf32>
    %207 = arith.addf %205, %206 : vector<8x32xf32>
    %208 = math.tanh %207 : vector<8x32xf32>
    %209 = arith.index_cast %185 : i32 to index
    %c0_83 = arith.constant 0 : index
    %210 = vector.load %arg15[%209, %c0_83] : memref<64x32xf32, #tpu.memory_space<vmem>>, vector<8x32xf32>
    %cst_84 = arith.constant dense<0.000000e+00> : vector<8x32xf32>
    %211 = tpu.matmul %181, %17, %cst_84 {dimension_numbers = #tpu.dot_dimension_numbers<[1], [0], [0], [1], [0, 0, 1, 1], [], []>} : vector<8x32xf32>, vector<32x32xf32>, vector<8x32xf32> -> vector<8x32xf32>
    %212 = arith.addf %210, %211 : vector<8x32xf32>
    %213 = arith.negf %212 : vector<8x32xf32>
    %214 = math.exp %213 : vector<8x32xf32>
    %cst_85 = arith.constant 1.000000e+00 : f32
    %215 = vector.broadcast %cst_85 : f32 to vector<8x32xf32>
    %216 = arith.addf %215, %214 : vector<8x32xf32>
    %217 = arith.divf %215, %216 : vector<8x32xf32>
    %218 = arith.mulf %203, %179 : vector<8x32xf32>
    %219 = arith.mulf %194, %208 : vector<8x32xf32>
    %220 = arith.addf %218, %219 : vector<8x32xf32>
    %221 = math.tanh %220 : vector<8x32xf32>
    %222 = arith.mulf %217, %221 : vector<8x32xf32>
    %223 = arith.index_cast %185 : i32 to index
    %c0_86 = arith.constant 0 : index
    %224 = vector.load %arg16[%223, %c0_86] : memref<64x32xf32, #tpu.memory_space<vmem>>, vector<8x32xf32>
    tpu.vector_store %arg16[%223, %c0_86], %222 {strides = array<i32>} : memref<64x32xf32, #tpu.memory_space<vmem>>, vector<8x32xf32>,
    %c5_i32 = arith.constant 5 : i32
    %c8_i32_87 = arith.constant 8 : i32
    %225 = arith.muli %c5_i32, %c8_i32_87 : i32
    %226 = tpu.assume_multiple %225, 8 : i32
    %227 = arith.index_cast %226 : i32 to index
    %c0_88 = arith.constant 0 : index
    %228 = vector.load %arg12[%227, %c0_88] : memref<64x32xf32, #tpu.memory_space<vmem>>, vector<8x32xf32>
    %cst_89 = arith.constant dense<0.000000e+00> : vector<8x32xf32>
    %229 = tpu.matmul %222, %14, %cst_89 {dimension_numbers = #tpu.dot_dimension_numbers<[1], [0], [0], [1], [0, 0, 1, 1], [], []>} : vector<8x32xf32>, vector<32x32xf32>, vector<8x32xf32> -> vector<8x32xf32>
    %230 = arith.addf %228, %229 : vector<8x32xf32>
    %231 = arith.negf %230 : vector<8x32xf32>
    %232 = math.exp %231 : vector<8x32xf32>
    %cst_90 = arith.constant 1.000000e+00 : f32
    %233 = vector.broadcast %cst_90 : f32 to vector<8x32xf32>
    %234 = arith.addf %233, %232 : vector<8x32xf32>
    %235 = arith.divf %233, %234 : vector<8x32xf32>
    %236 = arith.index_cast %226 : i32 to index
    %c0_91 = arith.constant 0 : index
    %237 = vector.load %arg13[%236, %c0_91] : memref<64x32xf32, #tpu.memory_space<vmem>>, vector<8x32xf32>
    %cst_92 = arith.constant dense<0.000000e+00> : vector<8x32xf32>
    %238 = tpu.matmul %222, %15, %cst_92 {dimension_numbers = #tpu.dot_dimension_numbers<[1], [0], [0], [1], [0, 0, 1, 1], [], []>} : vector<8x32xf32>, vector<32x32xf32>, vector<8x32xf32> -> vector<8x32xf32>
    %239 = arith.addf %237, %238 : vector<8x32xf32>
    %240 = arith.negf %239 : vector<8x32xf32>
    %241 = math.exp %240 : vector<8x32xf32>
    %cst_93 = arith.constant 1.000000e+00 : f32
    %242 = vector.broadcast %cst_93 : f32 to vector<8x32xf32>
    %243 = arith.addf %242, %241 : vector<8x32xf32>
    %244 = arith.divf %242, %243 : vector<8x32xf32>
    %245 = arith.index_cast %226 : i32 to index
    %c0_94 = arith.constant 0 : index
    %246 = vector.load %arg14[%245, %c0_94] : memref<64x32xf32, #tpu.memory_space<vmem>>, vector<8x32xf32>
    %cst_95 = arith.constant dense<0.000000e+00> : vector<8x32xf32>
    %247 = tpu.matmul %222, %16, %cst_95 {dimension_numbers = #tpu.dot_dimension_numbers<[1], [0], [0], [1], [0, 0, 1, 1], [], []>} : vector<8x32xf32>, vector<32x32xf32>, vector<8x32xf32> -> vector<8x32xf32>
    %248 = arith.addf %246, %247 : vector<8x32xf32>
    %249 = math.tanh %248 : vector<8x32xf32>
    %250 = arith.index_cast %226 : i32 to index
    %c0_96 = arith.constant 0 : index
    %251 = vector.load %arg15[%250, %c0_96] : memref<64x32xf32, #tpu.memory_space<vmem>>, vector<8x32xf32>
    %cst_97 = arith.constant dense<0.000000e+00> : vector<8x32xf32>
    %252 = tpu.matmul %222, %17, %cst_97 {dimension_numbers = #tpu.dot_dimension_numbers<[1], [0], [0], [1], [0, 0, 1, 1], [], []>} : vector<8x32xf32>, vector<32x32xf32>, vector<8x32xf32> -> vector<8x32xf32>
    %253 = arith.addf %251, %252 : vector<8x32xf32>
    %254 = arith.negf %253 : vector<8x32xf32>
    %255 = math.exp %254 : vector<8x32xf32>
    %cst_98 = arith.constant 1.000000e+00 : f32
    %256 = vector.broadcast %cst_98 : f32 to vector<8x32xf32>
    %257 = arith.addf %256, %255 : vector<8x32xf32>
    %258 = arith.divf %256, %257 : vector<8x32xf32>
    %259 = arith.mulf %244, %220 : vector<8x32xf32>
    %260 = arith.mulf %235, %249 : vector<8x32xf32>
    %261 = arith.addf %259, %260 : vector<8x32xf32>
    %262 = math.tanh %261 : vector<8x32xf32>
    %263 = arith.mulf %258, %262 : vector<8x32xf32>
    %264 = arith.index_cast %226 : i32 to index
    %c0_99 = arith.constant 0 : index
    %265 = vector.load %arg16[%264, %c0_99] : memref<64x32xf32, #tpu.memory_space<vmem>>, vector<8x32xf32>
    tpu.vector_store %arg16[%264, %c0_99], %263 {strides = array<i32>} : memref<64x32xf32, #tpu.memory_space<vmem>>, vector<8x32xf32>,
    %c6_i32 = arith.constant 6 : i32
    %c8_i32_100 = arith.constant 8 : i32
    %266 = arith.muli %c6_i32, %c8_i32_100 : i32
    %267 = tpu.assume_multiple %266, 8 : i32
    %268 = arith.index_cast %267 : i32 to index
    %c0_101 = arith.constant 0 : index
    %269 = vector.load %arg12[%268, %c0_101] : memref<64x32xf32, #tpu.memory_space<vmem>>, vector<8x32xf32>
    %cst_102 = arith.constant dense<0.000000e+00> : vector<8x32xf32>
    %270 = tpu.matmul %263, %14, %cst_102 {dimension_numbers = #tpu.dot_dimension_numbers<[1], [0], [0], [1], [0, 0, 1, 1], [], []>} : vector<8x32xf32>, vector<32x32xf32>, vector<8x32xf32> -> vector<8x32xf32>
    %271 = arith.addf %269, %270 : vector<8x32xf32>
    %272 = arith.negf %271 : vector<8x32xf32>
    %273 = math.exp %272 : vector<8x32xf32>
    %cst_103 = arith.constant 1.000000e+00 : f32
    %274 = vector.broadcast %cst_103 : f32 to vector<8x32xf32>
    %275 = arith.addf %274, %273 : vector<8x32xf32>
    %276 = arith.divf %274, %275 : vector<8x32xf32>
    %277 = arith.index_cast %267 : i32 to index
    %c0_104 = arith.constant 0 : index
    %278 = vector.load %arg13[%277, %c0_104] : memref<64x32xf32, #tpu.memory_space<vmem>>, vector<8x32xf32>
    %cst_105 = arith.constant dense<0.000000e+00> : vector<8x32xf32>
    %279 = tpu.matmul %263, %15, %cst_105 {dimension_numbers = #tpu.dot_dimension_numbers<[1], [0], [0], [1], [0, 0, 1, 1], [], []>} : vector<8x32xf32>, vector<32x32xf32>, vector<8x32xf32> -> vector<8x32xf32>
    %280 = arith.addf %278, %279 : vector<8x32xf32>
    %281 = arith.negf %280 : vector<8x32xf32>
    %282 = math.exp %281 : vector<8x32xf32>
    %cst_106 = arith.constant 1.000000e+00 : f32
    %283 = vector.broadcast %cst_106 : f32 to vector<8x32xf32>
    %284 = arith.addf %283, %282 : vector<8x32xf32>
    %285 = arith.divf %283, %284 : vector<8x32xf32>
    %286 = arith.index_cast %267 : i32 to index
    %c0_107 = arith.constant 0 : index
    %287 = vector.load %arg14[%286, %c0_107] : memref<64x32xf32, #tpu.memory_space<vmem>>, vector<8x32xf32>
    %cst_108 = arith.constant dense<0.000000e+00> : vector<8x32xf32>
    %288 = tpu.matmul %263, %16, %cst_108 {dimension_numbers = #tpu.dot_dimension_numbers<[1], [0], [0], [1], [0, 0, 1, 1], [], []>} : vector<8x32xf32>, vector<32x32xf32>, vector<8x32xf32> -> vector<8x32xf32>
    %289 = arith.addf %287, %288 : vector<8x32xf32>
    %290 = math.tanh %289 : vector<8x32xf32>
    %291 = arith.index_cast %267 : i32 to index
    %c0_109 = arith.constant 0 : index
    %292 = vector.load %arg15[%291, %c0_109] : memref<64x32xf32, #tpu.memory_space<vmem>>, vector<8x32xf32>
    %cst_110 = arith.constant dense<0.000000e+00> : vector<8x32xf32>
    %293 = tpu.matmul %263, %17, %cst_110 {dimension_numbers = #tpu.dot_dimension_numbers<[1], [0], [0], [1], [0, 0, 1, 1], [], []>} : vector<8x32xf32>, vector<32x32xf32>, vector<8x32xf32> -> vector<8x32xf32>
    %294 = arith.addf %292, %293 : vector<8x32xf32>
    %295 = arith.negf %294 : vector<8x32xf32>
    %296 = math.exp %295 : vector<8x32xf32>
    %cst_111 = arith.constant 1.000000e+00 : f32
    %297 = vector.broadcast %cst_111 : f32 to vector<8x32xf32>
    %298 = arith.addf %297, %296 : vector<8x32xf32>
    %299 = arith.divf %297, %298 : vector<8x32xf32>
    %300 = arith.mulf %285, %261 : vector<8x32xf32>
    %301 = arith.mulf %276, %290 : vector<8x32xf32>
    %302 = arith.addf %300, %301 : vector<8x32xf32>
    %303 = math.tanh %302 : vector<8x32xf32>
    %304 = arith.mulf %299, %303 : vector<8x32xf32>
    %305 = arith.index_cast %267 : i32 to index
    %c0_112 = arith.constant 0 : index
    %306 = vector.load %arg16[%305, %c0_112] : memref<64x32xf32, #tpu.memory_space<vmem>>, vector<8x32xf32>
    tpu.vector_store %arg16[%305, %c0_112], %304 {strides = array<i32>} : memref<64x32xf32, #tpu.memory_space<vmem>>, vector<8x32xf32>,
    %c7_i32 = arith.constant 7 : i32
    %c8_i32_113 = arith.constant 8 : i32
    %307 = arith.muli %c7_i32, %c8_i32_113 : i32
    %308 = tpu.assume_multiple %307, 8 : i32
    %309 = arith.index_cast %308 : i32 to index
    %c0_114 = arith.constant 0 : index
    %310 = vector.load %arg12[%309, %c0_114] : memref<64x32xf32, #tpu.memory_space<vmem>>, vector<8x32xf32>
    %cst_115 = arith.constant dense<0.000000e+00> : vector<8x32xf32>
    %311 = tpu.matmul %304, %14, %cst_115 {dimension_numbers = #tpu.dot_dimension_numbers<[1], [0], [0], [1], [0, 0, 1, 1], [], []>} : vector<8x32xf32>, vector<32x32xf32>, vector<8x32xf32> -> vector<8x32xf32>
    %312 = arith.addf %310, %311 : vector<8x32xf32>
    %313 = arith.negf %312 : vector<8x32xf32>
    %314 = math.exp %313 : vector<8x32xf32>
    %cst_116 = arith.constant 1.000000e+00 : f32
    %315 = vector.broadcast %cst_116 : f32 to vector<8x32xf32>
    %316 = arith.addf %315, %314 : vector<8x32xf32>
    %317 = arith.divf %315, %316 : vector<8x32xf32>
    %318 = arith.index_cast %308 : i32 to index
    %c0_117 = arith.constant 0 : index
    %319 = vector.load %arg13[%318, %c0_117] : memref<64x32xf32, #tpu.memory_space<vmem>>, vector<8x32xf32>
    %cst_118 = arith.constant dense<0.000000e+00> : vector<8x32xf32>
    %320 = tpu.matmul %304, %15, %cst_118 {dimension_numbers = #tpu.dot_dimension_numbers<[1], [0], [0], [1], [0, 0, 1, 1], [], []>} : vector<8x32xf32>, vector<32x32xf32>, vector<8x32xf32> -> vector<8x32xf32>
    %321 = arith.addf %319, %320 : vector<8x32xf32>
    %322 = arith.negf %321 : vector<8x32xf32>
    %323 = math.exp %322 : vector<8x32xf32>
    %cst_119 = arith.constant 1.000000e+00 : f32
    %324 = vector.broadcast %cst_119 : f32 to vector<8x32xf32>
    %325 = arith.addf %324, %323 : vector<8x32xf32>
    %326 = arith.divf %324, %325 : vector<8x32xf32>
    %327 = arith.index_cast %308 : i32 to index
    %c0_120 = arith.constant 0 : index
    %328 = vector.load %arg14[%327, %c0_120] : memref<64x32xf32, #tpu.memory_space<vmem>>, vector<8x32xf32>
    %cst_121 = arith.constant dense<0.000000e+00> : vector<8x32xf32>
    %329 = tpu.matmul %304, %16, %cst_121 {dimension_numbers = #tpu.dot_dimension_numbers<[1], [0], [0], [1], [0, 0, 1, 1], [], []>} : vector<8x32xf32>, vector<32x32xf32>, vector<8x32xf32> -> vector<8x32xf32>
    %330 = arith.addf %328, %329 : vector<8x32xf32>
    %331 = math.tanh %330 : vector<8x32xf32>
    %332 = arith.index_cast %308 : i32 to index
    %c0_122 = arith.constant 0 : index
    %333 = vector.load %arg15[%332, %c0_122] : memref<64x32xf32, #tpu.memory_space<vmem>>, vector<8x32xf32>
    %cst_123 = arith.constant dense<0.000000e+00> : vector<8x32xf32>
    %334 = tpu.matmul %304, %17, %cst_123 {dimension_numbers = #tpu.dot_dimension_numbers<[1], [0], [0], [1], [0, 0, 1, 1], [], []>} : vector<8x32xf32>, vector<32x32xf32>, vector<8x32xf32> -> vector<8x32xf32>
    %335 = arith.addf %333, %334 : vector<8x32xf32>
    %336 = arith.negf %335 : vector<8x32xf32>
    %337 = math.exp %336 : vector<8x32xf32>
    %cst_124 = arith.constant 1.000000e+00 : f32
    %338 = vector.broadcast %cst_124 : f32 to vector<8x32xf32>
    %339 = arith.addf %338, %337 : vector<8x32xf32>
    %340 = arith.divf %338, %339 : vector<8x32xf32>
    %341 = arith.mulf %326, %302 : vector<8x32xf32>
    %342 = arith.mulf %317, %331 : vector<8x32xf32>
    %343 = arith.addf %341, %342 : vector<8x32xf32>
    %344 = math.tanh %343 : vector<8x32xf32>
    %345 = arith.mulf %340, %344 : vector<8x32xf32>
    %346 = arith.index_cast %308 : i32 to index
    %c0_125 = arith.constant 0 : index
    %347 = vector.load %arg16[%346, %c0_125] : memref<64x32xf32, #tpu.memory_space<vmem>>, vector<8x32xf32>
    tpu.vector_store %arg16[%346, %c0_125], %345 {strides = array<i32>} : memref<64x32xf32, #tpu.memory_space<vmem>>, vector<8x32xf32>,
    %c8_i32_126 = arith.constant 8 : i32
    %c0_127 = arith.constant 0 : index
    %c0_128 = arith.constant 0 : index
    %348 = vector.load %arg16[%c0_127, %c0_128] : memref<64x32xf32, #tpu.memory_space<vmem>>, vector<64x32xf32>
    %c0_129 = arith.constant 0 : index
    %c0_130 = arith.constant 0 : index
    %349 = vector.load %arg7[%c0_129, %c0_130] : memref<32x32xf32, #tpu.memory_space<vmem>>, vector<32x32xf32>
    %cst_131 = arith.constant dense<0.000000e+00> : vector<64x32xf32>
    %350 = tpu.matmul %348, %349, %cst_131 {dimension_numbers = #tpu.dot_dimension_numbers<[1], [0], [0], [1], [0, 0, 1, 1], [], []>} : vector<64x32xf32>, vector<32x32xf32>, vector<64x32xf32> -> vector<64x32xf32>
    %c0_132 = arith.constant 0 : index
    %c0_133 = arith.constant 0 : index
    %351 = vector.load %arg8[%c0_132, %c0_133] : memref<1x32xf32, #tpu.memory_space<vmem>>, vector<1x32xf32>
    %352 = vector.broadcast %351 : vector<1x32xf32> to vector<64x32xf32>
    %353 = arith.addf %350, %352 : vector<64x32xf32>
    %cst_134 = arith.constant 0.000000e+00 : f32
    %354 = vector.broadcast %cst_134 : f32 to vector<64x32xf32>
    %355 = arith.maximumf %353, %354 : vector<64x32xf32>
    %cst_135 = arith.constant dense<0xFF800000> : vector<64xf32>
    %356 = vector.multi_reduction <maximumf>, %355, %cst_135 [1] : vector<64x32xf32> to vector<64xf32>
    %357 = vector.shape_cast %356 : vector<64xf32> to vector<64x1xf32>
    %358 = vector.broadcast %357 : vector<64x1xf32> to vector<64x32xf32>
    %359 = arith.subf %355, %358 : vector<64x32xf32>
    %360 = math.exp %359 : vector<64x32xf32>
    %cst_136 = arith.constant dense<0.000000e+00> : vector<64xf32>
    %361 = vector.multi_reduction <add>, %360, %cst_136 [1] : vector<64x32xf32> to vector<64xf32>
    %362 = vector.shape_cast %361 : vector<64xf32> to vector<64x1xf32>
    %363 = tpu.reciprocal %362 {approx = true} : vector<64x1xf32> -> vector<64x1xf32>
    %364 = arith.mulf %362, %363 : vector<64x1xf32>
    %cst_137 = arith.constant 2.000000e+00 : f32
    %365 = vector.broadcast %cst_137 : f32 to vector<64x1xf32>
    %366 = arith.subf %365, %364 : vector<64x1xf32>
    %367 = arith.mulf %363, %366 : vector<64x1xf32>
    %368 = vector.broadcast %367 : vector<64x1xf32> to vector<64x32xf32>
    %369 = arith.mulf %360, %368 : vector<64x32xf32>
    %370 = arith.mulf %348, %369 : vector<64x32xf32>
    %371 = vector.extract_strided_slice %370 {offsets = [0, 0], sizes = [8, 32], strides = [1, 1]} : vector<64x32xf32> to vector<8x32xf32>
    %372 = vector.extract_strided_slice %370 {offsets = [8, 0], sizes = [8, 32], strides = [1, 1]} : vector<64x32xf32> to vector<8x32xf32>
    %373 = arith.addf %371, %372 : vector<8x32xf32>
    %374 = vector.extract_strided_slice %370 {offsets = [16, 0], sizes = [8, 32], strides = [1, 1]} : vector<64x32xf32> to vector<8x32xf32>
    %375 = arith.addf %373, %374 : vector<8x32xf32>
    %376 = vector.extract_strided_slice %370 {offsets = [24, 0], sizes = [8, 32], strides = [1, 1]} : vector<64x32xf32> to vector<8x32xf32>
    %377 = arith.addf %375, %376 : vector<8x32xf32>
    %378 = vector.extract_strided_slice %370 {offsets = [32, 0], sizes = [8, 32], strides = [1, 1]} : vector<64x32xf32> to vector<8x32xf32>
    %379 = arith.addf %377, %378 : vector<8x32xf32>
    %380 = vector.extract_strided_slice %370 {offsets = [40, 0], sizes = [8, 32], strides = [1, 1]} : vector<64x32xf32> to vector<8x32xf32>
    %381 = arith.addf %379, %380 : vector<8x32xf32>
    %382 = vector.extract_strided_slice %370 {offsets = [48, 0], sizes = [8, 32], strides = [1, 1]} : vector<64x32xf32> to vector<8x32xf32>
    %383 = arith.addf %381, %382 : vector<8x32xf32>
    %384 = vector.extract_strided_slice %370 {offsets = [56, 0], sizes = [8, 32], strides = [1, 1]} : vector<64x32xf32> to vector<8x32xf32>
    %385 = arith.addf %383, %384 : vector<8x32xf32>
    %cst_138 = arith.constant 0.000000e+00 : f32
    %386 = vector.broadcast %cst_138 : f32 to vector<8x32xf32>
    %387 = arith.maximumf %385, %386 : vector<8x32xf32>
    %c0_139 = arith.constant 0 : index
    %c0_140 = arith.constant 0 : index
    %388 = vector.load %arg9[%c0_139, %c0_140] : memref<1x32xf32, #tpu.memory_space<vmem>>, vector<1x32xf32>
    %389 = vector.broadcast %388 : vector<1x32xf32> to vector<8x32xf32>
    %390 = arith.mulf %387, %389 : vector<8x32xf32>
    %cst_141 = arith.constant dense<0.000000e+00> : vector<8xf32>
    %391 = vector.multi_reduction <add>, %390, %cst_141 [1] : vector<8x32xf32> to vector<8xf32>
    %392 = vector.shape_cast %391 : vector<8xf32> to vector<8x1xf32>
    %c0_142 = arith.constant 0 : index
    %c0_143 = arith.constant 0 : index
    %393 = vector.load %arg10[%c0_142, %c0_143] : memref<1x1xf32, #tpu.memory_space<vmem>>, vector<1x1xf32>
    %394 = vector.broadcast %393 : vector<1x1xf32> to vector<8x1xf32>
    %395 = arith.addf %392, %394 : vector<8x1xf32>
    %c0_144 = arith.constant 0 : index
    %c0_145 = arith.constant 0 : index
    %396 = vector.load %arg11[%c0_144, %c0_145] : memref<8x1xf32, #tpu.memory_space<vmem>>, vector<8x1xf32>
    tpu.vector_store %arg11[%c0_144, %c0_145], %395 {strides = array<i32>} : memref<8x1xf32, #tpu.memory_space<vmem>>, vector<8x1xf32>,
    return
  }
}

</mosaic_0001>

<bundles_post_ra>
// kernel: lstm_with_attention.1
= control target key start
LH: loop header
LB: loop body
LE: loop exit
PB: predicated region body
PF: predicated region fallthrough
CT: control target
= control target key end

     0   :  { %vm54_vm0 = vcmask 130048   ;;  %v2014_v22 = vmov 0.0   ;;  %vm120_vm1 = vcmask 261120   ;;  %s2016_s28 = smov 96   ;;  %s2644_s1 = inlined_call_operand.vmem [shape: f32[16,128], index: 1, kind: input, shape index: {}]   ;;  %s2645_s0 = inlined_call_operand.vmem [shape: f32[64,16], index: 0, kind: input, shape index: {}]   ;;  %s2646_s3 = inlined_call_operand.vmem [shape: f32[32,32], index: 3, kind: input, shape index: {}]   ;;  %s2647_s4 = inlined_call_operand.vmem [shape: f32[32,32], index: 4, kind: input, shape index: {}]   ;;  %s2648_s5 = inlined_call_operand.vmem [shape: f32[32,32], index: 5, kind: input, shape index: {}]   ;;  %s2649_s2 = inlined_call_operand.vmem [shape: f32[1,128], index: 2, kind: input, shape index: {}]   ;;  %s2650_s6 = inlined_call_operand.vmem [shape: f32[32,32], index: 6, kind: input, shape index: {}]   ;;  %s2651_s7 = inlined_call_operand.vmem [shape: f32[32,32], index: 7, kind: input, shape index: {}]   ;;  %s2652_s8 = inlined_call_operand.vmem [shape: f32[1,32], index: 8, kind: input, shape index: {}]   ;;  %s2653_s9 = inlined_call_operand.vmem [shape: f32[1,32], index: 9, kind: input, shape index: {}]   ;;  %s2654_s10 = inlined_call_operand.<no memory space> [shape: f32[1,1], index: 10, kind: input, shape index: {}]   ;;  %s2655_s11 = inlined_call_operand.vmem [shape: f32[8,1], index: 11, kind: output, shape index: {}]  }
   0x1   :  { %v49_v0 = vld [vmem:[%s2644_s1 + $0x8] sm:$0xff]  ;;  %v48_v1 = vld [vmem:[%s2644_s1] sm:$0xff]  ;;  %v42_v3 = vld [vmem:[%s2645_s0 + $0x10] sm:$0xff] }
   0x2   :  { %93 = vmatpush.msra.mxu0 %v49_v0  ;;  %1828 = vmatpush.msra.mxu1 %v49_v0  ;;  %v40_v2 = vld [vmem:[%s2645_s0] sm:$0xff]  ;;  %v2093_v4 = vld [vmem:[%s2646_s3 + $0x18] sm:$0xff]  ;;  %v2103_v6 = vld [vmem:[%s2646_s3 + $0x10] sm:$0xff] }
   0x3   :  { %1829 = vmatpush.msra.mxu2 %v49_v0  ;;  %1830 = vmatpush.msra.mxu3 %v49_v0  ;;  %v44_v5 = vld [vmem:[%s2645_s0 + $0x20] sm:$0xff]  ;;  %v46_v7 = vld [vmem:[%s2645_s0 + $0x30] sm:$0xff]  ;;  %v2112_v8 = vld [vmem:[%s2647_s4 + $0x18] sm:$0xff] }
   0x4   :  { %94 = vmatpush.msra.mxu0 %v48_v1  ;;  %1831 = vmatpush.msra.mxu1 %v48_v1  ;;  %v2117_v9 = vld [vmem:[%s2648_s5 + $0x18] sm:$0xff]  ;;  %v2122_v10 = vld [vmem:[%s2646_s3 + $0x8] sm:$0xff]  ;;  %v2130_v11 = vld [vmem:[%s2647_s4 + $0x10] sm:$0xff] }
   0x5   :  { %1760 = vmatmul.msk.f32.vlgmr.msra.gmra.mxu0 %vm54_vm0, %v40_v2  ;;  %1762 = vmatmul.msk.f32.vlgmr.msra.gmra.mxu1 %vm54_vm0, %v42_v3  ;;  %v2135_v12 = vld [vmem:[%s2648_s5 + $0x10] sm:$0xff]  ;;  %v2140_v13 = vld [vmem:[%s2646_s3] sm:$0xff]  ;;  %v43_v14 = vld [vmem:[%s2645_s0 + $0x18] sm:$0xff]  ;;  %s2015_s3 = smov 64  }
   0x6   :  { %265 = vmatpush.msrb.mxu1 %v2093_v4  ;;  %1832 = vmatpush.msra.mxu2 %v48_v1  ;;  %v41_v15 = vld [vmem:[%s2645_s0 + $0x8] sm:$0xff]  ;;  %v47_v19 = vld [vmem:[%s2645_s0 + $0x38] sm:$0xff]  ;;  %v2177_v20 = vld [vmem:[%s2647_s4] sm:$0xff] }
   0x7   :  { %1833 = vmatpush.msra.mxu3 %v48_v1  ;;  %1764 = vmatmul.msk.f32.vlgmr.msra.gmra.mxu2 %vm54_vm0, %v44_v5  ;;  %v2156_v16 = vld [vmem:[%s2647_s4 + $0x8] sm:$0xff]  ;;  %v2184_v21 = vld [vmem:[%s2648_s5] sm:$0xff]  ;;  %v2211_v23 = vld [vmem:[%s2650_s6 + $0x18] sm:$0xff] }
   0x8   :  { %266 = vmatpush.msrb.mxu1 %v2103_v6  ;;  %1766 = vmatmul.msk.f32.vlgmr.msra.gmra.mxu3 %vm54_vm0, %v46_v7  ;;  %v2162_v17 = vld [vmem:[%s2648_s5 + $0x8] sm:$0xff]  ;;  %v2218_v24 = vld [vmem:[%s2650_s6 + $0x10] sm:$0xff]  ;;  %v2230_v26 = vld [vmem:[%s2650_s6] sm:$0xff] }
   0x9   :  { %306 = vmatpush.msrb.mxu2 %v2112_v8  ;;  %347 = vmatpush.msrb.mxu3 %v2117_v9  ;;  %v45_v18 = vld [vmem:[%s2645_s0 + $0x28] sm:$0xff]  ;;  %v1838_v27 = vld [vmem:[%s2649_s2] ss:$0 sm:$0xff]  ;;  %s2017_s2 = smov 32  }
   0xa   :  { %267 = vmatpush.msrb.mxu1 %v2122_v10  ;;  %1221 = vmatpush.msrb.mxu0 %v2093_v4  ;;  %v2225_v25 = vld [vmem:[%s2650_s6 + $0x8] sm:$0xff] }
   0xb   :  { %307 = vmatpush.msrb.mxu2 %v2130_v11  ;;  %348 = vmatpush.msrb.mxu3 %v2135_v12 }
   0xc   :  { %268 = vmatpush.msrb.mxu1 %v2140_v13  ;;  %1222 = vmatpush.msrb.mxu0 %v2103_v6 }
   0xd   :  { %1763 = vmatmul.msk.f32.gmra.mxu1 %vm54_vm0, %v43_v14  ;;  %1761 = vmatmul.msk.f32.gmra.mxu0 %vm54_vm0, %v41_v15 }
   0xe   :  { %308 = vmatpush.msrb.mxu2 %v2156_v16  ;;  %349 = vmatpush.msrb.mxu3 %v2162_v17 }
   0xf   :  { %1765 = vmatmul.msk.f32.gmra.mxu2 %vm54_vm0, %v45_v18  ;;  %1223 = vmatpush.msrb.mxu0 %v2122_v10 }
  0x10   :  { %1767 = vmatmul.msk.f32.gmra.mxu3 %vm54_vm0, %v47_v19  ;;  %309 = vmatpush.msrb.mxu2 %v2177_v20 }
  0x11   :  { %350 = vmatpush.msrb.mxu3 %v2184_v21  ;;  %1224 = vmatpush.msrb.mxu0 %v2140_v13 }
  0x12   :  { %421 = vmatpush.msra.mxu2 %v2093_v4  ;;  %370 = vmatpush.msra.mxu1 %v2211_v23 }
  0x13   :  { %463 = vmatpush.msra.mxu3 %v2112_v8  ;;  %1381 = vmatpush.msra.mxu0 %v2093_v4 }
  0x14   :  { %422 = vmatpush.msra.mxu2 %v2103_v6  ;;  %371 = vmatpush.msra.mxu1 %v2218_v24 }
  0x15   :  { %464 = vmatpush.msra.mxu3 %v2130_v11  ;;  %269 = vmatmul.f32.vlgmr.msrb.gmra.mxu1 %v2014_v22 }
  0x16   :  { %423 = vmatpush.msra.mxu2 %v2122_v10  ;;  %1382 = vmatpush.msra.mxu0 %v2103_v6 }
  0x17   :  { %465 = vmatpush.msra.mxu3 %v2156_v16  ;;  %310 = vmatmul.f32.vlgmr.msrb.gmra.mxu2 %v2014_v22 }
  0x18   :  { %351 = vmatmul.f32.vlgmr.msrb.gmra.mxu3 %v2014_v22  ;;  %424 = vmatpush.msra.mxu2 %v2140_v13 }
  0x19   :  { %466 = vmatpush.msra.mxu3 %v2177_v20  ;;  %1383 = vmatpush.msra.mxu0 %v2122_v10 }
  0x1a   :  { %529 = vmatpush.msrb.mxu2 %v2211_v23  ;;  %372 = vmatpush.msra.mxu1 %v2225_v25 }
  0x1b   :  { %581 = vmatpush.msrb.mxu3 %v2093_v4  ;;  %1384 = vmatpush.msra.mxu0 %v2140_v13 }
  0x1c   :  { %530 = vmatpush.msrb.mxu2 %v2218_v24  ;;  %373 = vmatpush.msra.mxu1 %v2230_v26 }
  0x1d   :  { %582 = vmatpush.msrb.mxu3 %v2103_v6  ;;  %374 = vmatmul.f32.vlgmr.msra.gmra.mxu1 %v2014_v22 }
  0x1e   :  { %531 = vmatpush.msrb.mxu2 %v2225_v25  ;;  %505 = vmatpush.msrb.mxu1 %v2117_v9 }
  0x1f   :  { %583 = vmatpush.msrb.mxu3 %v2122_v10 }
  0x20   :  { %532 = vmatpush.msrb.mxu2 %v2230_v26  ;;  %506 = vmatpush.msrb.mxu1 %v2135_v12 }
  0x21   :  { %584 = vmatpush.msrb.mxu3 %v2140_v13 }
  0x22   :  { %507 = vmatpush.msrb.mxu1 %v2162_v17 }
  0x24   :  { %508 = vmatpush.msrb.mxu1 %v2184_v21 }
  0x26   :  { %623 = vmatpush.msra.mxu1 %v2112_v8 }
  0x28   :  { %624 = vmatpush.msra.mxu1 %v2130_v11 }
  0x2a   :  { %625 = vmatpush.msra.mxu1 %v2156_v16 }
  0x2c   :  { %626 = vmatpush.msra.mxu1 %v2177_v20 }
  0x82   :  { %v96_v28 = vpop.f32.mrf.mxu0  ;;  %v102_v29 = vpop.f32.mrf.mxu1 }
  0x83   :  { %v97_v30 = vadd.f32 %v1838_v27, %v96_v28  ;;  %v103_v31 = vadd.f32 %v1838_v27, %v102_v29 }
  0x85   :  { %121 = vst.msk [vmem:[#allocation2] sm:$0xff] %vm120_vm1, %v97_v30  ;;  %169 = vrot.lane.b32.xlu1 %v97_v30, %s2015_s3  ;;  %137 = vrot.lane.b32.xlu0 %v97_v30, %s2016_s28 }
  0x86   :  { %123 = vst.msk [vmem:[#allocation2 + $0x10] sm:$0xff] %vm120_vm1, %v103_v31 }
  0x8a   :  { %v105_v32 = vpop.f32.mrf.mxu1  ;;  %v99_v33 = vpop.f32.mrf.mxu0 }
  0x8b   :  { %v106_v34 = vadd.f32 %v1838_v27, %v105_v32  ;;  %v100_v35 = vadd.f32 %v1838_v27, %v99_v33  ;;  %v108_v36 = vpop.f32.mrf.mxu2  ;;  %v114_v37 = vpop.f32.mrf.mxu3 }
  0x8c   :  { %v109_v38 = vadd.f32 %v1838_v27, %v108_v36  ;;  %v115_v39 = vadd.f32 %v1838_v27, %v114_v37  ;;  %v249_v45 = vld [vmem:[#allocation2] sm:$0xff] }
  0x8d   :  { %124 = vst.msk [vmem:[#allocation2 + $0x18] sm:$0xff] %vm120_vm1, %v106_v34  ;;  %201 = vrot.lane.b32.xlu0 %v97_v30, %s2017_s2  ;;  %203 = vrot.lane.b32.xlu2 %v100_v35, %s2017_s2 }
  0x8e   :  { %122 = vst.msk [vmem:[#allocation2 + $0x8] sm:$0xff] %vm120_vm1, %v100_v35  ;;  %139 = vrot.lane.b32.xlu1 %v100_v35, %s2016_s28 }
  0x8f   :  { %125 = vst.msk [vmem:[#allocation2 + $0x20] sm:$0xff] %vm120_vm1, %v109_v38 }
  0x90   :  { %127 = vst.msk [vmem:[#allocation2 + $0x30] sm:$0xff] %vm120_vm1, %v115_v39 }
  0x92   :  { %v270_v44 = vpop.f32.mrf.mxu1 }
  0x93   :  { %v111_v40 = vpop.f32.mrf.mxu2  ;;  %v117_v41 = vpop.f32.mrf.mxu3  ;;  %v273_v46 = vadd.f32 %v270_v44, %v249_v45 }
  0x94   :  { %v112_v42 = vadd.f32 %v1838_v27, %v111_v40  ;;  %v118_v43 = vadd.f32 %v1838_v27, %v117_v41 }
  0x95   :  { %171 = vrot.lane.b32.xlu2 %v100_v35, %s2015_s3  ;;  %141 = vrot.lane.b32.xlu0 %v103_v31, %s2016_s28  ;;  %v1768_v47 = vmul.f32 -1.442695, %v273_v46 }
  0x96   :  { %205 = vrot.lane.b32.xlu1 %v103_v31, %s2017_s2  ;;  %126 = vst.msk [vmem:[#allocation2 + $0x28] sm:$0xff] %vm120_vm1, %v112_v42 }
  0x97   :  { %128 = vst.msk [vmem:[#allocation2 + $0x38] sm:$0xff] %vm120_vm1, %v118_v43  ;;  %1842 = vpow2.f32 %v1768_v47 }
  0x9a   :  { %v375_v57 = vpop.f32.mrf.mxu1 }
  0x9b   :  { %v311_v52 = vpop.f32.mrf.mxu2  ;;  %v352_v5 = vpop.f32.mrf.mxu3 }
  0x9d   :  { %173 = vrot.lane.b32.xlu2 %v103_v31, %s2015_s3  ;;  %143 = vrot.lane.b32.xlu0 %v106_v34, %s2016_s28  ;;  %v1843_v50 = vpop.eup %1842 }
  0x9e   :  { %207 = vrot.lane.b32.xlu1 %v106_v34, %s2017_s2  ;;  %v277_v51 = vadd.f32 1.0, %v1843_v50 }
  0xa0   :  { %1844 = vrcp.f32 %v277_v51  ;;  %vm283_vm3 = vweird.f32 %v277_v51  ;;  %v289_v33 = vand.u32 2147483648, %v277_v51  ;;  %v287_v35 = vand.u32 2147483647, %v277_v51 }
  0xa2   :  { %vm288_vm8 = vcmp.eq.f32.partialorder %v287_v35, 8.507059e+37 }
  0xa5   :  { %175 = vrot.lane.b32.xlu2 %v106_v34, %s2015_s3  ;;  %145 = vrot.lane.b32.xlu0 %v109_v38, %s2016_s28 }
  0xa6   :  { %209 = vrot.lane.b32.xlu1 %v109_v38, %s2017_s2  ;;  %v1845_v59 = vpop.eup %1844 }
  0xa7   :  { %v279_v63 = vmul.f32 %v1845_v59, %v277_v51  ;;  %vm284_vm2 = vweird.f32 %v1845_v59 }
  0xa8   :  { %vm2286_vm5 = vmor %vm283_vm3, %vm284_vm2 }
  0xa9   :  { %v280_v2 = vsub.f32 1.0, %v279_v63 }
  0xab   :  { %v281_v15 = vmul.f32 %v1845_v59, %v280_v2 }
  0xad   :  { %177 = vrot.lane.b32.xlu2 %v109_v38, %s2015_s3  ;;  %147 = vrot.lane.b32.xlu0 %v112_v42, %s2016_s28  ;;  %v282_v31 = vadd.f32 %v1845_v59, %v281_v15 }
  0xae   :  { %211 = vrot.lane.b32.xlu1 %v112_v42, %s2017_s2 }
  0xb5   :  { %179 = vrot.lane.b32.xlu2 %v112_v42, %s2015_s3  ;;  %149 = vrot.lane.b32.xlu0 %v115_v39, %s2016_s28 }
  0xb6   :  { %213 = vrot.lane.b32.xlu1 %v115_v39, %s2017_s2 }
  0xbd   :  { %181 = vrot.lane.b32.xlu2 %v115_v39, %s2015_s3  ;;  %151 = vrot.lane.b32.xlu0 %v118_v43, %s2016_s28  ;;  %v286_v39 = vsel %vm2286_vm5, %v1845_v59, %v282_v31  ;;  %v405_v31 = vld [vmem:[#allocation2 + $0x8] sm:$0xff] }
  0xbe   :  { %215 = vrot.lane.b32.xlu1 %v118_v43, %s2017_s2 }
  0xc5   :  { %183 = vrot.lane.b32.xlu2 %v118_v43, %s2015_s3  ;;  %v290_v43 = vor.u32 1.1754944e-38, %v289_v33 }
  0xe7   :  { %v204_v1 = vpop.permute.xlu2 %203 }
  0xe8   :  { %226 = vst.msk [vmem:[#allocation5 + $0x8] sm:$0xff] %vm120_vm1, %v204_v1 }
  0xef   :  { %v172_v28 = vpop.permute.xlu2 %171 }
  0xf0   :  { %194 = vst.msk [vmem:[#allocation4 + $0x8] sm:$0xff] %vm120_vm1, %v172_v28 }
  0xf7   :  { %v170_v48 = vpop.permute.xlu1 %169  ;;  %v138_v49 = vpop.permute.xlu0 %137 }
  0xf8   :  { %193 = vst.msk [vmem:[#allocation4] sm:$0xff] %vm120_vm1, %v170_v48  ;;  %v174_v47 = vpop.permute.xlu2 %173  ;;  %v291_v48 = vsel %vm288_vm8, %v290_v43, %v286_v39 }
  0xf9   :  { %161 = vst.msk [vmem:[#allocation3] sm:$0xff] %vm120_vm1, %v138_v49 }
  0xfa   :  { %195 = vst.msk [vmem:[#allocation4 + $0x10] sm:$0xff] %vm120_vm1, %v174_v47 }
  0xff   :  { %v202_v53 = vpop.permute.xlu0 %201  ;;  %v334_v3 = vld [vmem:[#allocation4] sm:$0xff] }
 0x100   :  { %v293_v54 = vld [vmem:[#allocation3] sm:$0xff]  ;;  %225 = vst.msk [vmem:[#allocation5] sm:$0xff] %vm120_vm1, %v202_v53  ;;  %v355_v14 = vadd.f32 %v352_v5, %v334_v3  ;;  %v140_v22 = vpop.permute.xlu1 %139 }
 0x101   :  { %v314_v55 = vadd.f32 %v311_v52, %v293_v54  ;;  %162 = vst.msk [vmem:[#allocation3 + $0x8] sm:$0xff] %vm120_vm1, %v140_v22 }
 0x103   :  { %v1769_v56 = vmul.f32 -1.442695, %v314_v55 }
 0x105   :  { %1846 = vpow2.f32 %v1769_v56 }
 0x107   :  { %v357_v58 = vld [vmem:[#allocation5] sm:$0xff]  ;;  %v142_v29 = vpop.permute.xlu0 %141 }
 0x108   :  { %v378_v60 = vadd.f32 %v375_v57, %v357_v58  ;;  %163 = vst.msk [vmem:[#allocation3 + $0x10] sm:$0xff] %vm120_vm1, %v142_v29  ;;  %v206_v45 = vpop.permute.xlu1 %205 }
 0x109   :  { %227 = vst.msk [vmem:[#allocation5 + $0x10] sm:$0xff] %vm120_vm1, %v206_v45 }
 0x10a   :  { %v1770_v61 = vmul.f32 -1.442695, %v378_v60  ;;  %v176_v60 = vpop.permute.xlu2 %175 }
 0x10b   :  { %v1847_v62 = vpop.eup %1846  ;;  %196 = vst.msk [vmem:[#allocation4 + $0x18] sm:$0xff] %vm120_vm1, %v176_v60 }
 0x10c   :  { %v318_v0 = vadd.f32 1.0, %v1847_v62  ;;  %1848 = vpow2.f32 %v1770_v61 }
 0x10e   :  { %1850 = vrcp.f32 %v318_v0  ;;  %v330_v32 = vand.u32 2147483648, %v318_v0  ;;  %v328_v36 = vand.u32 2147483647, %v318_v0  ;;  %vm324_vm6 = vweird.f32 %v318_v0 }
 0x10f   :  { %v144_v51 = vpop.permute.xlu0 %143 }
 0x110   :  { %v331_v42 = vor.u32 1.1754944e-38, %v330_v32  ;;  %vm329_vm9 = vcmp.eq.f32.partialorder %v328_v36, 8.507059e+37  ;;  %164 = vst.msk [vmem:[#allocation3 + $0x18] sm:$0xff] %vm120_vm1, %v144_v51  ;;  %v208_v59 = vpop.permute.xlu1 %207 }
 0x111   :  { %228 = vst.msk [vmem:[#allocation5 + $0x18] sm:$0xff] %vm120_vm1, %v208_v59 }
 0x112   :  { %v1849_v7 = vpop.eup %1848  ;;  %v178_v5 = vpop.permute.xlu2 %177 }
 0x113   :  { %v382_v18 = vadd.f32 1.0, %v1849_v7  ;;  %197 = vst.msk [vmem:[#allocation4 + $0x20] sm:$0xff] %vm120_vm1, %v178_v5 }
 0x114   :  { %v1851_v19 = vpop.eup %1850 }
 0x115   :  { %v320_v27 = vmul.f32 %v1851_v19, %v318_v0  ;;  %1852 = vrcp.f32 %v382_v18  ;;  %vm325_vm4 = vweird.f32 %v1851_v19  ;;  %v394_v57 = vand.u32 2147483648, %v382_v18 }
 0x116   :  { %1854 = vtanh.f32 %v355_v14  ;;  %vm326_vm7 = vmor %vm324_vm6, %vm325_vm4  ;;  %vm388_vm11 = vweird.f32 %v382_v18  ;;  %v392_v58 = vand.u32 2147483647, %v382_v18 }
 0x117   :  { %v321_v30 = vsub.f32 1.0, %v320_v27  ;;  %v146_v62 = vpop.permute.xlu0 %145  ;;  %v395_v63 = vor.u32 1.1754944e-38, %v394_v57 }
 0x118   :  { %165 = vst.msk [vmem:[#allocation3 + $0x20] sm:$0xff] %vm120_vm1, %v146_v62  ;;  %vm393_vm13 = vcmp.eq.f32.partialorder %v392_v58, 8.507059e+37  ;;  %v210_v3 = vpop.permute.xlu1 %209 }
 0x119   :  { %v322_v34 = vmul.f32 %v1851_v19, %v321_v30  ;;  %229 = vst.msk [vmem:[#allocation5 + $0x20] sm:$0xff] %vm120_vm1, %v210_v3  ;;  %v450_v30 = vld [vmem:[#allocation3 + $0x8] sm:$0xff] }
 0x11a   :  { %v180_v15 = vpop.permute.xlu2 %179 }
 0x11b   :  { %v1853_v38 = vpop.eup %1852  ;;  %v323_v40 = vadd.f32 %v1851_v19, %v322_v34  ;;  %198 = vst.msk [vmem:[#allocation4 + $0x28] sm:$0xff] %vm120_vm1, %v180_v15 }
 0x11c   :  { %v1855_v41 = vpop.eup %1854  ;;  %v384_v44 = vmul.f32 %v1853_v38, %v382_v18  ;;  %vm389_vm10 = vweird.f32 %v1853_v38 }
 0x11d   :  { %v327_v46 = vsel %vm326_vm7, %v1851_v19, %v323_v40  ;;  %v399_v53 = vmul.f32 %v1855_v41, %v291_v48  ;;  %vm390_vm12 = vmor %vm388_vm11, %vm389_vm10  ;;  %v492_v48 = vld [vmem:[#allocation4 + $0x8] sm:$0xff] }
 0x11e   :  { %v332_v49 = vsel %vm329_vm9, %v331_v42, %v327_v46  ;;  %v385_v50 = vsub.f32 1.0, %v384_v44 }
 0x11f   :  { %v398_v52 = vmul.f32 0.0, %v332_v49  ;;  %v148_v7 = vpop.permute.xlu0 %147 }
 0x120   :  { %v386_v54 = vmul.f32 %v1853_v38, %v385_v50  ;;  %166 = vst.msk [vmem:[#allocation3 + $0x28] sm:$0xff] %vm120_vm1, %v148_v7  ;;  %v212_v14 = vpop.permute.xlu1 %211 }
 0x121   :  { %v2295_v55 = vadd.f32 %v399_v53, %v398_v52  ;;  %230 = vst.msk [vmem:[#allocation5 + $0x28] sm:$0xff] %vm120_vm1, %v212_v14 }
 0x122   :  { %v387_v56 = vadd.f32 %v1853_v38, %v386_v54  ;;  %v182_v22 = vpop.permute.xlu2 %181 }
 0x123   :  { %1856 = vtanh.f32 %v2295_v55  ;;  %199 = vst.msk [vmem:[#allocation4 + $0x30] sm:$0xff] %vm120_vm1, %v182_v22 }
 0x124   :  { %v391_v61 = vsel %vm390_vm12, %v1853_v38, %v387_v56  ;;  %v516_v38 = vld [vmem:[#allocation5 + $0x8] sm:$0xff] }
 0x125   :  { %v396_v1 = vsel %vm393_vm13, %v395_v63, %v391_v61 }
 0x127   :  { %v150_v18 = vpop.permute.xlu0 %149 }
 0x128   :  { %167 = vst.msk [vmem:[#allocation3 + $0x30] sm:$0xff] %vm120_vm1, %v150_v18  ;;  %v214_v19 = vpop.permute.xlu1 %213 }
 0x129   :  { %v1857_v0 = vpop.eup %1856  ;;  %231 = vst.msk [vmem:[#allocation5 + $0x30] sm:$0xff] %vm120_vm1, %v214_v19 }
 0x12a   :  { %v402_v2 = vmul.f32 %v1857_v0, %v396_v1  ;;  %v184_v29 = vpop.permute.xlu2 %183 }
 0x12b   :  { %200 = vst.msk [vmem:[#allocation4 + $0x38] sm:$0xff] %vm120_vm1, %v184_v29 }
 0x12c   :  { %403 = vst.msk [vmem:[#allocation6] sm:$0xff] %vm120_vm1, %v402_v2  ;;  %1771 = vmatmul.msk.f32.vlgmr.msra.gmra.mxu2 %vm120_vm1, %v402_v2  ;;  %1773 = vmatmul.msk.f32.vlgmr.msra.gmra.mxu3 %vm120_vm1, %v402_v2 }
 0x12d   :  { %1775 = vmatmul.msk.f32.vlgmr.msrb.gmra.mxu1 %vm120_vm1, %v402_v2  ;;  %665 = vmatpush.msra.mxu2 %v2117_v9 }
 0x12e   :  { %689 = vmatpush.msra.mxu3 %v2211_v23  ;;  %741 = vmatpush.msrb.mxu1 %v2093_v4 }
 0x12f   :  { %666 = vmatpush.msra.mxu2 %v2135_v12  ;;  %v152_v27 = vpop.permute.xlu0 %151 }
 0x130   :  { %690 = vmatpush.msra.mxu3 %v2218_v24  ;;  %742 = vmatpush.msrb.mxu1 %v2103_v6  ;;  %168 = vst.msk [vmem:[#allocation3 + $0x38] sm:$0xff] %vm120_vm1, %v152_v27  ;;  %v216_v28 = vpop.permute.xlu1 %215 }
 0x131   :  { %667 = vmatpush.msra.mxu2 %v2162_v17  ;;  %232 = vst.msk [vmem:[#allocation5 + $0x38] sm:$0xff] %vm120_vm1, %v216_v28 }
 0x132   :  { %691 = vmatpush.msra.mxu3 %v2225_v25  ;;  %743 = vmatpush.msrb.mxu1 %v2122_v10 }
 0x133   :  { %668 = vmatpush.msra.mxu2 %v2184_v21 }
 0x134   :  { %1776 = vmatmul.msk.f32.vlgmr.msrb.gmra.mxu2 %vm120_vm1, %v402_v2  ;;  %692 = vmatpush.msra.mxu3 %v2230_v26 }
 0x135   :  { %783 = vmatpush.msrb.mxu2 %v2112_v8  ;;  %744 = vmatpush.msrb.mxu1 %v2140_v13 }
 0x137   :  { %784 = vmatpush.msrb.mxu2 %v2130_v11 }
 0x139   :  { %785 = vmatpush.msrb.mxu2 %v2156_v16 }
 0x13b   :  { %786 = vmatpush.msrb.mxu2 %v2177_v20 }
 0x1aa   :  { %v510_v46 = vpop.f32.mrf.mxu1 }
 0x1ab   :  { %v513_v50 = vadd.f32 %v510_v46, %v492_v48 }
 0x1af   :  { %v426_v32 = vpop.f32.mrf.mxu2  ;;  %v468_v33 = vpop.f32.mrf.mxu3 }
 0x1b0   :  { %v429_v34 = vadd.f32 %v426_v32, %v405_v31  ;;  %v471_v35 = vadd.f32 %v468_v33, %v450_v30 }
 0x1b2   :  { %v1772_v36 = vmul.f32 -1.442695, %v429_v34  ;;  %v1774_v37 = vmul.f32 -1.442695, %v471_v35 }
 0x1b4   :  { %1858 = vpow2.f32 %v1772_v36 }
 0x1b5   :  { %1860 = vpow2.f32 %v1774_v37 }
 0x1b7   :  { %v534_v39 = vpop.f32.mrf.mxu2 }
 0x1b8   :  { %v537_v40 = vadd.f32 %v534_v39, %v516_v38 }
 0x1ba   :  { %v1859_v41 = vpop.eup %1858  ;;  %v1777_v42 = vmul.f32 -1.442695, %v537_v40 }
 0x1bb   :  { %v1861_v43 = vpop.eup %1860  ;;  %v433_v44 = vadd.f32 1.0, %v1859_v41 }
 0x1bc   :  { %v475_v45 = vadd.f32 1.0, %v1861_v43  ;;  %1862 = vpow2.f32 %v1777_v42  ;;  %v565_v43 = vld [vmem:[#allocation2 + $0x10] sm:$0xff] }
 0x1bd   :  { %1864 = vrcp.f32 %v433_v44  ;;  %v445_v57 = vand.u32 2147483648, %v433_v44  ;;  %v443_v60 = vand.u32 2147483647, %v433_v44  ;;  %vm439_vm0 = vweird.f32 %v433_v44 }
 0x1be   :  { %1866 = vrcp.f32 %v475_v45  ;;  %v487_v61 = vand.u32 2147483648, %v475_v45  ;;  %v485_v63 = vand.u32 2147483647, %v475_v45  ;;  %vm481_vm3 = vweird.f32 %v475_v45 }
 0x1bf   :  { %v446_v2 = vor.u32 1.1754944e-38, %v445_v57  ;;  %vm444_vm4 = vcmp.eq.f32.partialorder %v443_v60, 8.507059e+37 }
 0x1c0   :  { %v488_v7 = vor.u32 1.1754944e-38, %v487_v61  ;;  %vm486_vm6 = vcmp.eq.f32.partialorder %v485_v63, 8.507059e+37 }
 0x1c2   :  { %v1863_v47 = vpop.eup %1862 }
 0x1c3   :  { %v1865_v49 = vpop.eup %1864  ;;  %v541_v51 = vadd.f32 1.0, %v1863_v47 }
 0x1c4   :  { %v1867_v52 = vpop.eup %1866  ;;  %v435_v53 = vmul.f32 %v1865_v49, %v433_v44  ;;  %vm440_vm14 = vweird.f32 %v1865_v49 }
 0x1c5   :  { %v477_v54 = vmul.f32 %v1867_v52, %v475_v45  ;;  %1868 = vrcp.f32 %v541_v51  ;;  %vm482_vm15 = vweird.f32 %v1867_v52  ;;  %vm441_vm2 = vmor %vm439_vm0, %vm440_vm14  ;;  %v553_v33 = vand.u32 2147483648, %v541_v51 }
 0x1c6   :  { %v436_v56 = vsub.f32 1.0, %v435_v53  ;;  %1870 = vtanh.f32 %v513_v50  ;;  %vm483_vm5 = vmor %vm481_vm3, %vm482_vm15  ;;  %vm547_vm8 = vweird.f32 %v541_v51  ;;  %v551_v34 = vand.u32 2147483647, %v541_v51 }
 0x1c7   :  { %v478_v58 = vsub.f32 1.0, %v477_v54  ;;  %v554_v36 = vor.u32 1.1754944e-38, %v553_v33 }
 0x1c8   :  { %v437_v59 = vmul.f32 %v1865_v49, %v436_v56  ;;  %vm552_vm10 = vcmp.eq.f32.partialorder %v551_v34, 8.507059e+37 }
 0x1c9   :  { %v479_v62 = vmul.f32 %v1867_v52, %v478_v58 }
 0x1ca   :  { %v438_v0 = vadd.f32 %v1865_v49, %v437_v59 }
 0x1cb   :  { %v1869_v1 = vpop.eup %1868  ;;  %v480_v3 = vadd.f32 %v1867_v52, %v479_v62  ;;  %v652_v62 = vld [vmem:[#allocation4 + $0x10] sm:$0xff] }
 0x1cc   :  { %v442_v5 = vsel %vm441_vm2, %v1865_v49, %v438_v0  ;;  %v543_v14 = vmul.f32 %v1869_v1, %v541_v51  ;;  %v1871_v15 = vpop.eup %1870  ;;  %vm548_vm7 = vweird.f32 %v1869_v1  ;;  %v676_v49 = vld [vmem:[#allocation5 + $0x10] sm:$0xff] }
 0x1cd   :  { %v447_v18 = vsel %vm444_vm4, %v446_v2, %v442_v5  ;;  %v484_v19 = vsel %vm483_vm5, %v1867_v52, %v480_v3  ;;  %vm549_vm9 = vmor %vm547_vm8, %vm548_vm7 }
 0x1ce   :  { %v558_v22 = vmul.f32 %v1871_v15, %v447_v18  ;;  %v489_v27 = vsel %vm486_vm6, %v488_v7, %v484_v19  ;;  %v544_v28 = vsub.f32 1.0, %v543_v14 }
 0x1cf   :  { %v557_v29 = vmul.f32 %v489_v27, %v2295_v55  ;;  %v610_v55 = vld [vmem:[#allocation3 + $0x10] sm:$0xff] }
 0x1d0   :  { %v545_v30 = vmul.f32 %v1869_v1, %v544_v28 }
 0x1d1   :  { %v2334_v31 = vadd.f32 %v558_v22, %v557_v29 }
 0x1d2   :  { %v546_v32 = vadd.f32 %v1869_v1, %v545_v30 }
 0x1d3   :  { %1872 = vtanh.f32 %v2334_v31 }
 0x1d4   :  { %v550_v35 = vsel %vm549_vm9, %v1869_v1, %v546_v32 }
 0x1d5   :  { %v555_v38 = vsel %vm552_vm10, %v554_v36, %v550_v35 }
 0x1d9   :  { %v1873_v37 = vpop.eup %1872 }
 0x1da   :  { %v561_v39 = vmul.f32 %v1873_v37, %v555_v38 }
 0x1dc   :  { %563 = vst.msk [vmem:[#allocation6 + $0x8] sm:$0xff] %vm120_vm1, %v561_v39  ;;  %1778 = vmatmul.msk.f32.vlgmr.msrb.gmra.mxu3 %vm120_vm1, %v561_v39  ;;  %1780 = vmatmul.msk.f32.vlgmr.msra.gmra.mxu1 %vm120_vm1, %v561_v39 }
 0x1dd   :  { %1782 = vmatmul.msk.f32.vlgmr.msra.gmra.mxu2 %vm120_vm1, %v561_v39  ;;  %825 = vmatpush.msrb.mxu3 %v2117_v9 }
 0x1de   :  { %849 = vmatpush.msra.mxu1 %v2211_v23  ;;  %901 = vmatpush.msra.mxu2 %v2093_v4 }
 0x1df   :  { %826 = vmatpush.msrb.mxu3 %v2135_v12 }
 0x1e0   :  { %850 = vmatpush.msra.mxu1 %v2218_v24  ;;  %902 = vmatpush.msra.mxu2 %v2103_v6 }
 0x1e1   :  { %827 = vmatpush.msrb.mxu3 %v2162_v17 }
 0x1e2   :  { %851 = vmatpush.msra.mxu1 %v2225_v25  ;;  %903 = vmatpush.msra.mxu2 %v2122_v10 }
 0x1e3   :  { %828 = vmatpush.msrb.mxu3 %v2184_v21 }
 0x1e4   :  { %1783 = vmatmul.msk.f32.vlgmr.msra.gmra.mxu3 %vm120_vm1, %v561_v39  ;;  %852 = vmatpush.msra.mxu1 %v2230_v26 }
 0x1e5   :  { %943 = vmatpush.msra.mxu3 %v2112_v8  ;;  %904 = vmatpush.msra.mxu2 %v2140_v13 }
 0x1e7   :  { %944 = vmatpush.msra.mxu3 %v2130_v11 }
 0x1e9   :  { %945 = vmatpush.msra.mxu3 %v2156_v16 }
 0x1eb   :  { %946 = vmatpush.msra.mxu3 %v2177_v20 }
 0x259   :  { %v628_v40 = vpop.f32.mrf.mxu1 }
 0x25a   :  { %v631_v41 = vadd.f32 %v628_v40, %v610_v55 }
 0x25c   :  { %v1781_v42 = vmul.f32 -1.442695, %v631_v41 }
 0x25e   :  { %1874 = vpow2.f32 %v1781_v42 }
 0x25f   :  { %v586_v44 = vpop.f32.mrf.mxu3 }
 0x260   :  { %v589_v45 = vadd.f32 %v586_v44, %v565_v43  ;;  %v670_v59 = vpop.f32.mrf.mxu2 }
 0x261   :  { %v673_v0 = vadd.f32 %v670_v59, %v652_v62 }
 0x262   :  { %v1779_v46 = vmul.f32 -1.442695, %v589_v45 }
 0x264   :  { %v1875_v47 = vpop.eup %1874  ;;  %1876 = vpow2.f32 %v1779_v46 }
 0x265   :  { %v635_v48 = vadd.f32 1.0, %v1875_v47 }
 0x267   :  { %1878 = vrcp.f32 %v635_v48  ;;  %v694_v50 = vpop.f32.mrf.mxu3  ;;  %v647_v5 = vand.u32 2147483648, %v635_v48  ;;  %vm641_vm12 = vweird.f32 %v635_v48  ;;  %v645_v14 = vand.u32 2147483647, %v635_v48 }
 0x268   :  { %v697_v51 = vadd.f32 %v694_v50, %v676_v49 }
 0x269   :  { %v648_v27 = vor.u32 1.1754944e-38, %v647_v5  ;;  %vm646_vm0 = vcmp.eq.f32.partialorder %v645_v14, 8.507059e+37 }
 0x26a   :  { %v1877_v52 = vpop.eup %1876  ;;  %v1784_v53 = vmul.f32 -1.442695, %v697_v51 }
 0x26b   :  { %v593_v54 = vadd.f32 1.0, %v1877_v52 }
 0x26c   :  { %1880 = vpow2.f32 %v1784_v53 }
 0x26d   :  { %v1879_v56 = vpop.eup %1878  ;;  %1882 = vrcp.f32 %v593_v54  ;;  %v605_v15 = vand.u32 2147483648, %v593_v54  ;;  %v603_v19 = vand.u32 2147483647, %v593_v54  ;;  %vm599_vm15 = vweird.f32 %v593_v54 }
 0x26e   :  { %v637_v57 = vmul.f32 %v1879_v56, %v635_v48  ;;  %vm642_vm11 = vweird.f32 %v1879_v56 }
 0x26f   :  { %vm643_vm13 = vmor %vm641_vm12, %vm642_vm11  ;;  %v606_v30 = vor.u32 1.1754944e-38, %v605_v15  ;;  %vm604_vm3 = vcmp.eq.f32.partialorder %v603_v19, 8.507059e+37 }
 0x270   :  { %v638_v58 = vsub.f32 1.0, %v637_v57 }
 0x272   :  { %v1881_v60 = vpop.eup %1880  ;;  %v639_v61 = vmul.f32 %v1879_v56, %v638_v58 }
 0x273   :  { %v1883_v63 = vpop.eup %1882  ;;  %v701_v1 = vadd.f32 1.0, %v1881_v60  ;;  %v812_v60 = vld [vmem:[#allocation4 + $0x18] sm:$0xff] }
 0x274   :  { %v595_v2 = vmul.f32 %v1883_v63, %v593_v54  ;;  %v640_v3 = vadd.f32 %v1879_v56, %v639_v61  ;;  %vm600_vm14 = vweird.f32 %v1883_v63 }
 0x275   :  { %1884 = vrcp.f32 %v701_v1  ;;  %vm601_vm2 = vmor %vm599_vm15, %vm600_vm14  ;;  %v713_v41 = vand.u32 2147483648, %v701_v1  ;;  %vm707_vm5 = vweird.f32 %v701_v1  ;;  %v711_v43 = vand.u32 2147483647, %v701_v1 }
 0x276   :  { %v596_v7 = vsub.f32 1.0, %v595_v2  ;;  %1886 = vtanh.f32 %v673_v0  ;;  %v644_v22 = vsel %vm643_vm13, %v1879_v56, %v640_v3 }
 0x277   :  { %v649_v32 = vsel %vm646_vm0, %v648_v27, %v644_v22  ;;  %v714_v45 = vor.u32 1.1754944e-38, %v713_v41  ;;  %vm712_vm7 = vcmp.eq.f32.partialorder %v711_v43, 8.507059e+37 }
 0x278   :  { %v597_v18 = vmul.f32 %v1883_v63, %v596_v7  ;;  %v717_v37 = vmul.f32 %v649_v32, %v2334_v31  ;;  %v836_v31 = vld [vmem:[#allocation5 + $0x18] sm:$0xff] }
 0x27a   :  { %v598_v28 = vadd.f32 %v1883_v63, %v597_v18 }
 0x27b   :  { %v1885_v29 = vpop.eup %1884 }
 0x27c   :  { %v602_v33 = vsel %vm601_vm2, %v1883_v63, %v598_v28  ;;  %v703_v34 = vmul.f32 %v1885_v29, %v701_v1  ;;  %v1887_v35 = vpop.eup %1886  ;;  %vm708_vm4 = vweird.f32 %v1885_v29 }
 0x27d   :  { %v607_v36 = vsel %vm604_vm3, %v606_v30, %v602_v33  ;;  %vm709_vm6 = vmor %vm707_vm5, %vm708_vm4 }
 0x27e   :  { %v718_v38 = vmul.f32 %v1887_v35, %v607_v36  ;;  %v704_v39 = vsub.f32 1.0, %v703_v34 }
 0x280   :  { %v2359_v55 = vadd.f32 %v718_v38, %v717_v37  ;;  %v705_v40 = vmul.f32 %v1885_v29, %v704_v39 }
 0x282   :  { %1888 = vtanh.f32 %v2359_v55  ;;  %v706_v42 = vadd.f32 %v1885_v29, %v705_v40 }
 0x284   :  { %v710_v44 = vsel %vm709_vm6, %v1885_v29, %v706_v42 }
 0x285   :  { %v715_v47 = vsel %vm712_vm7, %v714_v45, %v710_v44 }
 0x288   :  { %v1889_v46 = vpop.eup %1888 }
 0x289   :  { %v721_v48 = vmul.f32 %v1889_v46, %v715_v47  ;;  %v2401_v47 = vld [vmem:[%s2647_s4 + $0x18] sm:$0xff] }
 0x28b   :  { %723 = vst.msk [vmem:[#allocation6 + $0x10] sm:$0xff] %vm120_vm1, %v721_v48  ;;  %1785 = vmatmul.msk.f32.vlgmr.msrb.gmra.mxu1 %vm120_vm1, %v721_v48  ;;  %1787 = vmatmul.msk.f32.vlgmr.msrb.gmra.mxu2 %vm120_vm1, %v721_v48 }
 0x28c   :  { %1789 = vmatmul.msk.f32.vlgmr.msrb.gmra.mxu3 %vm120_vm1, %v721_v48  ;;  %985 = vmatpush.msrb.mxu1 %v2117_v9 }
 0x28d   :  { %1009 = vmatpush.msrb.mxu2 %v2211_v23  ;;  %1061 = vmatpush.msrb.mxu3 %v2093_v4  ;;  %v725_v4 = vld [vmem:[#allocation2 + $0x18] sm:$0xff] }
 0x28e   :  { %986 = vmatpush.msrb.mxu1 %v2135_v12  ;;  %v770_v12 = vld [vmem:[#allocation3 + $0x18] sm:$0xff] }
 0x28f   :  { %1010 = vmatpush.msrb.mxu2 %v2218_v24  ;;  %1062 = vmatpush.msrb.mxu3 %v2103_v6 }
 0x290   :  { %987 = vmatpush.msrb.mxu1 %v2162_v17 }
 0x291   :  { %1011 = vmatpush.msrb.mxu2 %v2225_v25  ;;  %1063 = vmatpush.msrb.mxu3 %v2122_v10 }
 0x292   :  { %988 = vmatpush.msrb.mxu1 %v2184_v21 }
 0x293   :  { %1790 = vmatmul.msk.f32.vlgmr.msra.gmra.mxu1 %vm120_vm1, %v721_v48  ;;  %1012 = vmatpush.msrb.mxu2 %v2230_v26  ;;  %v2407_v48 = vld [vmem:[%s2648_s5 + $0x10] sm:$0xff] }
 0x294   :  { %1103 = vmatpush.msra.mxu1 %v2112_v8  ;;  %1064 = vmatpush.msrb.mxu3 %v2140_v13 }
 0x296   :  { %1104 = vmatpush.msra.mxu1 %v2130_v11 }
 0x298   :  { %1105 = vmatpush.msra.mxu1 %v2156_v16 }
 0x29a   :  { %1106 = vmatpush.msra.mxu1 %v2177_v20 }
 0x308   :  { %v746_v6 = vpop.f32.mrf.mxu1 }
 0x309   :  { %v749_v9 = vadd.f32 %v746_v6, %v725_v4  ;;  %v2420_v4 = vld [vmem:[%s2648_s5 + $0x8] sm:$0xff]  ;;  %v2433_v6 = vld [vmem:[%s2648_s5] sm:$0xff] }
 0x30b   :  { %v1786_v10 = vmul.f32 -1.442695, %v749_v9  ;;  %v885_v9 = vld [vmem:[#allocation2 + $0x20] sm:$0xff] }
 0x30d   :  { %1890 = vpow2.f32 %v1786_v10 }
 0x30e   :  { %v788_v17 = vpop.f32.mrf.mxu2 }
 0x30f   :  { %v791_v21 = vadd.f32 %v788_v17, %v770_v12  ;;  %v830_v58 = vpop.f32.mrf.mxu3  ;;  %v930_v12 = vld [vmem:[#allocation3 + $0x20] sm:$0xff] }
 0x310   :  { %v854_v49 = vpop.f32.mrf.mxu1  ;;  %v833_v62 = vadd.f32 %v830_v58, %v812_v60 }
 0x311   :  { %v1788_v50 = vmul.f32 -1.442695, %v791_v21  ;;  %v857_v8 = vadd.f32 %v854_v49, %v836_v31 }
 0x313   :  { %v1891_v51 = vpop.eup %1890  ;;  %1892 = vpow2.f32 %v1788_v50  ;;  %v1791_v13 = vmul.f32 -1.442695, %v857_v8  ;;  %v996_v50 = vld [vmem:[#allocation5 + $0x20] sm:$0xff] }
 0x314   :  { %v753_v11 = vadd.f32 1.0, %v1891_v51 }
 0x315   :  { %1894 = vpow2.f32 %v1791_v13 }
 0x316   :  { %1896 = vrcp.f32 %v753_v11  ;;  %v765_v1 = vand.u32 2147483648, %v753_v11  ;;  %vm759_vm9 = vweird.f32 %v753_v11  ;;  %v763_v5 = vand.u32 2147483647, %v753_v11 }
 0x318   :  { %v766_v22 = vor.u32 1.1754944e-38, %v765_v1  ;;  %vm764_vm13 = vcmp.eq.f32.partialorder %v763_v5, 8.507059e+37 }
 0x319   :  { %v1893_v16 = vpop.eup %1892 }
 0x31a   :  { %v795_v20 = vadd.f32 1.0, %v1893_v16 }
 0x31b   :  { %v1895_v52 = vpop.eup %1894 }
 0x31c   :  { %v1897_v53 = vpop.eup %1896  ;;  %1898 = vrcp.f32 %v795_v20  ;;  %v861_v56 = vadd.f32 1.0, %v1895_v52  ;;  %v807_v7 = vand.u32 2147483648, %v795_v20  ;;  %v805_v19 = vand.u32 2147483647, %v795_v20 }
 0x31d   :  { %v755_v54 = vmul.f32 %v1897_v53, %v753_v11  ;;  %vm760_vm8 = vweird.f32 %v1897_v53  ;;  %vm801_vm12 = vweird.f32 %v795_v20 }
 0x31e   :  { %1900 = vrcp.f32 %v861_v56  ;;  %vm761_vm10 = vmor %vm759_vm9, %vm760_vm8  ;;  %v808_v29 = vor.u32 1.1754944e-38, %v807_v7  ;;  %vm806_vm15 = vcmp.eq.f32.partialorder %v805_v19, 8.507059e+37  ;;  %v873_v40 = vand.u32 2147483648, %v861_v56 }
 0x31f   :  { %v756_v57 = vsub.f32 1.0, %v755_v54  ;;  %1902 = vtanh.f32 %v833_v62  ;;  %vm867_vm2 = vweird.f32 %v861_v56  ;;  %v871_v41 = vand.u32 2147483647, %v861_v56 }
 0x320   :  { %v874_v43 = vor.u32 1.1754944e-38, %v873_v40 }
 0x321   :  { %v757_v59 = vmul.f32 %v1897_v53, %v756_v57  ;;  %vm872_vm4 = vcmp.eq.f32.partialorder %v871_v41, 8.507059e+37 }
 0x322   :  { %v1899_v61 = vpop.eup %1898 }
 0x323   :  { %v797_v63 = vmul.f32 %v1899_v61, %v795_v20  ;;  %v758_v0 = vadd.f32 %v1897_v53, %v757_v59  ;;  %vm802_vm11 = vweird.f32 %v1899_v61 }
 0x324   :  { %v1901_v2 = vpop.eup %1900  ;;  %vm803_vm14 = vmor %vm801_vm12, %vm802_vm11 }
 0x325   :  { %v798_v3 = vsub.f32 1.0, %v797_v63  ;;  %v863_v14 = vmul.f32 %v1901_v2, %v861_v56  ;;  %v762_v18 = vsel %vm761_vm10, %v1897_v53, %v758_v0  ;;  %v1903_v33 = vpop.eup %1902  ;;  %vm868_vm0 = vweird.f32 %v1901_v2  ;;  %v972_v56 = vld [vmem:[#allocation4 + $0x20] sm:$0xff] }
 0x326   :  { %v767_v30 = vsel %vm764_vm13, %v766_v22, %v762_v18  ;;  %vm869_vm3 = vmor %vm867_vm2, %vm868_vm0 }
 0x327   :  { %v799_v15 = vmul.f32 %v1899_v61, %v798_v3  ;;  %v864_v27 = vsub.f32 1.0, %v863_v14  ;;  %v878_v37 = vmul.f32 %v1903_v33, %v767_v30 }
 0x329   :  { %v800_v28 = vadd.f32 %v1899_v61, %v799_v15  ;;  %v865_v35 = vmul.f32 %v1901_v2, %v864_v27 }
 0x32b   :  { %v804_v32 = vsel %vm803_vm14, %v1899_v61, %v800_v28  ;;  %v866_v39 = vadd.f32 %v1901_v2, %v865_v35 }
 0x32c   :  { %v809_v34 = vsel %vm806_vm15, %v808_v29, %v804_v32 }
 0x32d   :  { %v877_v36 = vmul.f32 %v809_v34, %v2359_v55  ;;  %v870_v42 = vsel %vm869_vm3, %v1901_v2, %v866_v39  ;;  %v2394_v55 = vld [vmem:[%s2648_s5 + $0x18] sm:$0xff] }
 0x32e   :  { %v875_v45 = vsel %vm872_vm4, %v874_v43, %v870_v42 }
 0x32f   :  { %v2384_v38 = vadd.f32 %v878_v37, %v877_v36 }
 0x331   :  { %1904 = vtanh.f32 %v2384_v38 }
 0x337   :  { %v1905_v44 = vpop.eup %1904 }
 0x338   :  { %v881_v46 = vmul.f32 %v1905_v44, %v875_v45 }
 0x33a   :  { %883 = vst.msk [vmem:[#allocation6 + $0x18] sm:$0xff] %vm120_vm1, %v881_v46  ;;  %1792 = vmatmul.msk.f32.vlgmr.msra.gmra.mxu2 %vm120_vm1, %v881_v46  ;;  %1794 = vmatmul.msk.f32.vlgmr.msra.gmra.mxu3 %vm120_vm1, %v881_v46 }
 0x33b   :  { %1796 = vmatmul.msk.f32.vlgmr.msrb.gmra.mxu1 %vm120_vm1, %v881_v46  ;;  %1145 = vmatpush.msra.mxu2 %v2394_v55 }
 0x33c   :  { %1169 = vmatpush.msra.mxu3 %v2211_v23  ;;  %1263 = vmatpush.msrb.mxu1 %v2401_v47  ;;  %v2414_v23 = vld [vmem:[%s2647_s4 + $0x10] sm:$0xff] }
 0x33d   :  { %1146 = vmatpush.msra.mxu2 %v2407_v48 }
 0x33e   :  { %1170 = vmatpush.msra.mxu3 %v2218_v24  ;;  %1264 = vmatpush.msrb.mxu1 %v2414_v23  ;;  %v2427_v24 = vld [vmem:[%s2647_s4 + $0x8] sm:$0xff] }
 0x33f   :  { %1147 = vmatpush.msra.mxu2 %v2420_v4 }
 0x340   :  { %1171 = vmatpush.msra.mxu3 %v2225_v25  ;;  %1265 = vmatpush.msrb.mxu1 %v2427_v24  ;;  %v2442_v25 = vld [vmem:[%s2647_s4] sm:$0xff] }
 0x341   :  { %1148 = vmatpush.msra.mxu2 %v2433_v6 }
 0x342   :  { %1797 = vmatmul.msk.f32.vlgmr.msrb.gmra.mxu2 %vm120_vm1, %v881_v46  ;;  %1172 = vmatpush.msra.mxu3 %v2230_v26 }
 0x343   :  { %1305 = vmatpush.msrb.mxu2 %v2394_v55  ;;  %1266 = vmatpush.msrb.mxu1 %v2442_v25 }
 0x345   :  { %1306 = vmatpush.msrb.mxu2 %v2407_v48 }
 0x347   :  { %1307 = vmatpush.msrb.mxu2 %v2420_v4 }
 0x349   :  { %1308 = vmatpush.msrb.mxu2 %v2433_v6 }
 0x3b8   :  { %v990_v53 = vpop.f32.mrf.mxu1 }
 0x3b9   :  { %v993_v58 = vadd.f32 %v990_v53, %v972_v56 }
 0x3bd   :  { %v906_v10 = vpop.f32.mrf.mxu2  ;;  %v948_v17 = vpop.f32.mrf.mxu3 }
 0x3be   :  { %v909_v26 = vadd.f32 %v906_v10, %v885_v9  ;;  %v951_v21 = vadd.f32 %v948_v17, %v930_v12  ;;  %v2011_v12 = vld [vmem:[%s2650_s6 + $0x10] sm:$0xff]  ;;  %v2012_v17 = vld [vmem:[%s2650_s6 + $0x8] sm:$0xff] }
 0x3c0   :  { %v1793_v31 = vmul.f32 -1.442695, %v909_v26  ;;  %v1795_v49 = vmul.f32 -1.442695, %v951_v21 }
 0x3c2   :  { %1906 = vpow2.f32 %v1793_v31 }
 0x3c3   :  { %1908 = vpow2.f32 %v1795_v49 }
 0x3c5   :  { %v1014_v8 = vpop.f32.mrf.mxu2 }
 0x3c6   :  { %v1017_v51 = vadd.f32 %v1014_v8, %v996_v50 }
 0x3c8   :  { %v1907_v13 = vpop.eup %1906  ;;  %v1798_v11 = vmul.f32 -1.442695, %v1017_v51 }
 0x3c9   :  { %v1909_v16 = vpop.eup %1908  ;;  %v913_v20 = vadd.f32 1.0, %v1907_v13 }
 0x3ca   :  { %v955_v52 = vadd.f32 1.0, %v1909_v16  ;;  %1910 = vpow2.f32 %v1798_v11 }
 0x3cb   :  { %1912 = vrcp.f32 %v913_v20  ;;  %v925_v0 = vand.u32 2147483648, %v913_v20  ;;  %v923_v3 = vand.u32 2147483647, %v913_v20  ;;  %vm919_vm7 = vweird.f32 %v913_v20 }
 0x3cc   :  { %1914 = vrcp.f32 %v955_v52  ;;  %v967_v5 = vand.u32 2147483648, %v955_v52  ;;  %v965_v14 = vand.u32 2147483647, %v955_v52  ;;  %vm961_vm9 = vweird.f32 %v955_v52 }
 0x3cd   :  { %v926_v19 = vor.u32 1.1754944e-38, %v925_v0  ;;  %vm924_vm10 = vcmp.eq.f32.partialorder %v923_v3, 8.507059e+37 }
 0x3ce   :  { %v968_v28 = vor.u32 1.1754944e-38, %v967_v5  ;;  %vm966_vm12 = vcmp.eq.f32.partialorder %v965_v14, 8.507059e+37 }
 0x3d0   :  { %v1911_v54 = vpop.eup %1910 }
 0x3d1   :  { %v1913_v57 = vpop.eup %1912  ;;  %v1021_v59 = vadd.f32 1.0, %v1911_v54 }
 0x3d2   :  { %v1915_v60 = vpop.eup %1914  ;;  %v915_v61 = vmul.f32 %v1913_v57, %v913_v20  ;;  %vm920_vm5 = vweird.f32 %v1913_v57 }
 0x3d3   :  { %v957_v62 = vmul.f32 %v1915_v60, %v955_v52  ;;  %1916 = vrcp.f32 %v1021_v59  ;;  %vm962_vm6 = vweird.f32 %v1915_v60  ;;  %vm921_vm8 = vmor %vm919_vm7, %vm920_vm5  ;;  %v1033_v42 = vand.u32 2147483648, %v1021_v59 }
 0x3d4   :  { %v916_v63 = vsub.f32 1.0, %v915_v61  ;;  %1918 = vtanh.f32 %v993_v58  ;;  %vm963_vm11 = vmor %vm961_vm9, %vm962_vm6  ;;  %vm1027_vm14 = vweird.f32 %v1021_v59  ;;  %v1031_v43 = vand.u32 2147483647, %v1021_v59 }
 0x3d5   :  { %v958_v1 = vsub.f32 1.0, %v957_v62  ;;  %v1034_v45 = vor.u32 1.1754944e-38, %v1033_v42 }
 0x3d6   :  { %v917_v2 = vmul.f32 %v1913_v57, %v916_v63  ;;  %vm1032_vm0 = vcmp.eq.f32.partialorder %v1031_v43, 8.507059e+37 }
 0x3d7   :  { %v959_v7 = vmul.f32 %v1915_v60, %v958_v1 }
 0x3d8   :  { %v918_v15 = vadd.f32 %v1913_v57, %v917_v2 }
 0x3d9   :  { %v1917_v18 = vpop.eup %1916  ;;  %v960_v22 = vadd.f32 %v1915_v60, %v959_v7 }
 0x3da   :  { %v922_v27 = vsel %vm921_vm8, %v1913_v57, %v918_v15  ;;  %v1023_v29 = vmul.f32 %v1917_v18, %v1021_v59  ;;  %v1919_v30 = vpop.eup %1918  ;;  %vm1028_vm13 = vweird.f32 %v1917_v18  ;;  %v1132_v57 = vld [vmem:[#allocation4 + $0x28] sm:$0xff] }
 0x3db   :  { %v927_v32 = vsel %vm924_vm10, %v926_v19, %v922_v27  ;;  %v964_v33 = vsel %vm963_vm11, %v1915_v60, %v960_v22  ;;  %vm1029_vm15 = vmor %vm1027_vm14, %vm1028_vm13 }
 0x3dc   :  { %v1038_v34 = vmul.f32 %v1919_v30, %v927_v32  ;;  %v969_v35 = vsel %vm966_vm12, %v968_v28, %v964_v33  ;;  %v1024_v36 = vsub.f32 1.0, %v1023_v29 }
 0x3dd   :  { %v1037_v37 = vmul.f32 %v969_v35, %v2384_v38  ;;  %v2010_v38 = vld [vmem:[%s2650_s6 + $0x18] sm:$0xff] }
 0x3de   :  { %v1025_v39 = vmul.f32 %v1917_v18, %v1024_v36 }
 0x3df   :  { %v2449_v40 = vadd.f32 %v1038_v34, %v1037_v37 }
 0x3e0   :  { %v1026_v41 = vadd.f32 %v1917_v18, %v1025_v39 }
 0x3e1   :  { %1920 = vtanh.f32 %v2449_v40 }
 0x3e2   :  { %v1030_v44 = vsel %vm1029_vm15, %v1917_v18, %v1026_v41 }
 0x3e3   :  { %v1035_v9 = vsel %vm1032_vm0, %v1034_v45, %v1030_v44 }
 0x3e7   :  { %v1921_v46 = vpop.eup %1920 }
 0x3e8   :  { %v1041_v10 = vmul.f32 %v1921_v46, %v1035_v9 }
 0x3ea   :  { %1043 = vst.msk [vmem:[#allocation6 + $0x20] sm:$0xff] %vm120_vm1, %v1041_v10  ;;  %1799 = vmatmul.msk.f32.vlgmr.msrb.gmra.mxu3 %vm120_vm1, %v1041_v10  ;;  %1801 = vmatmul.msk.f32.vlgmr.msra.gmra.mxu1 %vm120_vm1, %v1041_v10 }
 0x3eb   :  { %1803 = vmatmul.msk.f32.vlgmr.msra.gmra.mxu2 %vm120_vm1, %v1041_v10  ;;  %1329 = vmatpush.msrb.mxu3 %v2010_v38 }
 0x3ec   :  { %1423 = vmatpush.msra.mxu1 %v2401_v47  ;;  %1465 = vmatpush.msra.mxu2 %v2394_v55  ;;  %v2013_v55 = vld [vmem:[%s2650_s6] sm:$0xff]  ;;  %v1090_v47 = vld [vmem:[#allocation3 + $0x28] sm:$0xff] }
 0x3ed   :  { %1330 = vmatpush.msrb.mxu3 %v2011_v12 }
 0x3ee   :  { %1424 = vmatpush.msra.mxu1 %v2414_v23  ;;  %1466 = vmatpush.msra.mxu2 %v2407_v48 }
 0x3ef   :  { %1331 = vmatpush.msrb.mxu3 %v2012_v17 }
 0x3f0   :  { %1425 = vmatpush.msra.mxu1 %v2427_v24  ;;  %1467 = vmatpush.msra.mxu2 %v2420_v4  ;;  %v1045_v4 = vld [vmem:[#allocation2 + $0x28] sm:$0xff] }
 0x3f1   :  { %1332 = vmatpush.msrb.mxu3 %v2013_v55 }
 0x3f2   :  { %1804 = vmatmul.msk.f32.vlgmr.msra.gmra.mxu3 %vm120_vm1, %v1041_v10  ;;  %1426 = vmatpush.msra.mxu1 %v2442_v25  ;;  %v1156_v25 = vld [vmem:[#allocation5 + $0x28] sm:$0xff]  ;;  %v1250_v10 = vld [vmem:[#allocation3 + $0x30] sm:$0xff] }
 0x3f3   :  { %1489 = vmatpush.msra.mxu3 %v2010_v38  ;;  %1468 = vmatpush.msra.mxu2 %v2433_v6 }
 0x3f5   :  { %1490 = vmatpush.msra.mxu3 %v2011_v12 }
 0x3f7   :  { %1491 = vmatpush.msra.mxu3 %v2012_v17 }
 0x3f9   :  { %1492 = vmatpush.msra.mxu3 %v2013_v55 }
 0x467   :  { %v1108_v48 = vpop.f32.mrf.mxu1 }
 0x468   :  { %v1111_v23 = vadd.f32 %v1108_v48, %v1090_v47  ;;  %v1316_v48 = vld [vmem:[#allocation5 + $0x30] sm:$0xff] }
 0x46a   :  { %v1802_v24 = vmul.f32 -1.442695, %v1111_v23 }
 0x46c   :  { %1922 = vpow2.f32 %v1802_v24 }
 0x46d   :  { %v1066_v26 = vpop.f32.mrf.mxu3 }
 0x46e   :  { %v1069_v21 = vadd.f32 %v1066_v26, %v1045_v4  ;;  %v1150_v53 = vpop.f32.mrf.mxu2 }
 0x46f   :  { %v1153_v59 = vadd.f32 %v1150_v53, %v1132_v57 }
 0x470   :  { %v1800_v31 = vmul.f32 -1.442695, %v1069_v21 }
 0x472   :  { %v1923_v49 = vpop.eup %1922  ;;  %1924 = vpow2.f32 %v1800_v31 }
 0x473   :  { %v1115_v50 = vadd.f32 1.0, %v1923_v49 }
 0x475   :  { %1926 = vrcp.f32 %v1115_v50  ;;  %v1174_v8 = vpop.f32.mrf.mxu3  ;;  %v1127_v63 = vand.u32 2147483648, %v1115_v50  ;;  %vm1121_vm3 = vweird.f32 %v1115_v50  ;;  %v1125_v1 = vand.u32 2147483647, %v1115_v50 }
 0x476   :  { %v1177_v51 = vadd.f32 %v1174_v8, %v1156_v25  ;;  %v1534_v25 = vld [vmem:[%s2651_s7 + $0x10] sm:$0xff]  ;;  %v1533_v8 = vld [vmem:[%s2651_s7 + $0x8] sm:$0xff] }
 0x477   :  { %v1128_v14 = vor.u32 1.1754944e-38, %v1127_v63  ;;  %vm1126_vm7 = vcmp.eq.f32.partialorder %v1125_v1, 8.507059e+37 }
 0x478   :  { %v1925_v6 = vpop.eup %1924  ;;  %v1805_v13 = vmul.f32 -1.442695, %v1177_v51 }
 0x479   :  { %v1073_v11 = vadd.f32 1.0, %v1925_v6 }
 0x47a   :  { %1928 = vpow2.f32 %v1805_v13  ;;  %v1532_v13 = vld [vmem:[%s2651_s7] sm:$0xff] }
 0x47b   :  { %v1927_v16 = vpop.eup %1926  ;;  %1930 = vrcp.f32 %v1073_v11  ;;  %v1085_v2 = vand.u32 2147483648, %v1073_v11  ;;  %v1083_v5 = vand.u32 2147483647, %v1073_v11  ;;  %vm1079_vm6 = vweird.f32 %v1073_v11 }
 0x47c   :  { %v1117_v20 = vmul.f32 %v1927_v16, %v1115_v50  ;;  %vm1122_vm2 = vweird.f32 %v1927_v16  ;;  %v1535_v50 = vld [vmem:[%s2651_s7 + $0x18] sm:$0xff] }
 0x47d   :  { %vm1123_vm4 = vmor %vm1121_vm3, %vm1122_vm2  ;;  %v1086_v19 = vor.u32 1.1754944e-38, %v1085_v2  ;;  %vm1084_vm9 = vcmp.eq.f32.partialorder %v1083_v5, 8.507059e+37 }
 0x47e   :  { %v1118_v52 = vsub.f32 1.0, %v1117_v20 }
 0x480   :  { %v1929_v54 = vpop.eup %1928  ;;  %v1119_v56 = vmul.f32 %v1927_v16, %v1118_v52 }
 0x481   :  { %v1931_v58 = vpop.eup %1930  ;;  %v1181_v60 = vadd.f32 1.0, %v1929_v54 }
 0x482   :  { %v1075_v61 = vmul.f32 %v1931_v58, %v1073_v11  ;;  %v1120_v62 = vadd.f32 %v1927_v16, %v1119_v56  ;;  %vm1080_vm5 = vweird.f32 %v1931_v58  ;;  %v1292_v11 = vld [vmem:[#allocation4 + $0x30] sm:$0xff] }
 0x483   :  { %1932 = vrcp.f32 %v1181_v60  ;;  %vm1081_vm8 = vmor %vm1079_vm6, %vm1080_vm5  ;;  %v1193_v37 = vand.u32 2147483648, %v1181_v60  ;;  %vm1187_vm11 = vweird.f32 %v1181_v60  ;;  %v1191_v41 = vand.u32 2147483647, %v1181_v60 }
 0x484   :  { %v1076_v0 = vsub.f32 1.0, %v1075_v61  ;;  %1934 = vtanh.f32 %v1153_v59  ;;  %v1124_v7 = vsel %vm1123_vm4, %v1927_v16, %v1120_v62 }
 0x485   :  { %v1129_v22 = vsel %vm1126_vm7, %v1128_v14, %v1124_v7  ;;  %v1194_v43 = vor.u32 1.1754944e-38, %v1193_v37  ;;  %vm1192_vm13 = vcmp.eq.f32.partialorder %v1191_v41, 8.507059e+37 }
 0x486   :  { %v1077_v3 = vmul.f32 %v1931_v58, %v1076_v0  ;;  %v1197_v32 = vmul.f32 %v1129_v22, %v2449_v40  ;;  %v1205_v40 = vld [vmem:[#allocation2 + $0x30] sm:$0xff] }
 0x488   :  { %v1078_v15 = vadd.f32 %v1931_v58, %v1077_v3 }
 0x489   :  { %v1933_v18 = vpop.eup %1932 }
 0x48a   :  { %v1082_v27 = vsel %vm1081_vm8, %v1931_v58, %v1078_v15  ;;  %v1183_v28 = vmul.f32 %v1933_v18, %v1181_v60  ;;  %v1935_v29 = vpop.eup %1934  ;;  %vm1188_vm10 = vweird.f32 %v1933_v18 }
 0x48b   :  { %v1087_v30 = vsel %vm1084_vm9, %v1086_v19, %v1082_v27  ;;  %vm1189_vm12 = vmor %vm1187_vm11, %vm1188_vm10 }
 0x48c   :  { %v1198_v33 = vmul.f32 %v1935_v29, %v1087_v30  ;;  %v1184_v34 = vsub.f32 1.0, %v1183_v28 }
 0x48e   :  { %v2478_v35 = vadd.f32 %v1198_v33, %v1197_v32  ;;  %v1185_v36 = vmul.f32 %v1933_v18, %v1184_v34 }
 0x490   :  { %1936 = vtanh.f32 %v2478_v35  ;;  %v1186_v39 = vadd.f32 %v1933_v18, %v1185_v36 }
 0x492   :  { %v1190_v42 = vsel %vm1189_vm12, %v1933_v18, %v1186_v39 }
 0x493   :  { %v1195_v45 = vsel %vm1192_vm13, %v1194_v43, %v1190_v42 }
 0x496   :  { %v1937_v44 = vpop.eup %1936 }
 0x497   :  { %v1201_v46 = vmul.f32 %v1937_v44, %v1195_v45  ;;  %v2511_v45 = vld [vmem:[#allocation6 + $0x8] sm:$0xff] }
 0x499   :  { %1203 = vst.msk [vmem:[#allocation6 + $0x28] sm:$0xff] %vm120_vm1, %v1201_v46  ;;  %1806 = vmatmul.msk.f32.vlgmr.msrb.gmra.mxu0 %vm120_vm1, %v1201_v46  ;;  %1808 = vmatmul.msk.f32.vlgmr.msrb.gmra.mxu1 %vm120_vm1, %v1201_v46 }
 0x49a   :  { %1810 = vmatmul.msk.f32.vlgmr.msrb.gmra.mxu2 %vm120_vm1, %v1201_v46  ;;  %1811 = vmatmul.msk.f32.vlgmr.msrb.gmra.mxu3 %vm120_vm1, %v1201_v46  ;;  %v2515_v46 = vld [vmem:[#allocation6 + $0x10] sm:$0xff] }
 0x49b   :  { %1576 = vmatpush.msrb.mxu0 %v1535_v50 }
 0x49d   :  { %1577 = vmatpush.msrb.mxu0 %v1534_v25 }
 0x49f   :  { %1578 = vmatpush.msrb.mxu0 %v1533_v8 }
 0x4a1   :  { %1579 = vmatpush.msrb.mxu0 %v1532_v13 }
 0x516   :  { %v1226_v9 = vpop.f32.mrf.mxu0  ;;  %v1268_v38 = vpop.f32.mrf.mxu1 }
 0x517   :  { %v1229_v12 = vadd.f32 %v1226_v9, %v1205_v40  ;;  %v1271_v17 = vadd.f32 %v1268_v38, %v1250_v10  ;;  %v2519_v40 = vld [vmem:[#allocation6 + $0x18] sm:$0xff]  ;;  %v2523_v9 = vld [vmem:[#allocation6 + $0x20] sm:$0xff]  ;;  %v2527_v10 = vld [vmem:[#allocation6 + $0x28] sm:$0xff] }
 0x519   :  { %v1807_v55 = vmul.f32 -1.442695, %v1229_v12  ;;  %v1809_v47 = vmul.f32 -1.442695, %v1271_v17  ;;  %v1365_v12 = vld [vmem:[#allocation2 + $0x38] sm:$0xff] }
 0x51b   :  { %1938 = vpow2.f32 %v1807_v55  ;;  %v1410_v55 = vld [vmem:[#allocation3 + $0x38] sm:$0xff] }
 0x51c   :  { %1940 = vpow2.f32 %v1809_v47 }
 0x51d   :  { %v1334_v23 = vpop.f32.mrf.mxu3  ;;  %v1310_v51 = vpop.f32.mrf.mxu2 }
 0x51e   :  { %v1337_v24 = vadd.f32 %v1334_v23, %v1316_v48  ;;  %v1313_v52 = vadd.f32 %v1310_v51, %v1292_v11 }
 0x520   :  { %v1812_v4 = vmul.f32 -1.442695, %v1337_v24 }
 0x521   :  { %v1939_v26 = vpop.eup %1938 }
 0x522   :  { %v1941_v21 = vpop.eup %1940  ;;  %v1233_v31 = vadd.f32 1.0, %v1939_v26  ;;  %1942 = vpow2.f32 %v1812_v4  ;;  %v2538_v26 = vld [vmem:[%s2652_s8] ss:$0 sm:$0xff] }
 0x523   :  { %v1275_v49 = vadd.f32 1.0, %v1941_v21  ;;  %v1476_v21 = vld [vmem:[#allocation5 + $0x38] sm:$0xff] }
 0x524   :  { %1944 = vrcp.f32 %v1233_v31  ;;  %v1245_v59 = vand.u32 2147483648, %v1233_v31  ;;  %v1243_v62 = vand.u32 2147483647, %v1233_v31  ;;  %vm1239_vm0 = vweird.f32 %v1233_v31 }
 0x525   :  { %1946 = vrcp.f32 %v1275_v49  ;;  %v1287_v60 = vand.u32 2147483648, %v1275_v49  ;;  %v1285_v0 = vand.u32 2147483647, %v1275_v49  ;;  %vm1281_vm2 = vweird.f32 %v1275_v49 }
 0x526   :  { %v1246_v3 = vor.u32 1.1754944e-38, %v1245_v59  ;;  %vm1244_vm5 = vcmp.eq.f32.partialorder %v1243_v62, 8.507059e+37 }
 0x527   :  { %v1288_v14 = vor.u32 1.1754944e-38, %v1287_v60  ;;  %vm1286_vm6 = vcmp.eq.f32.partialorder %v1285_v0, 8.507059e+37 }
 0x528   :  { %v1943_v6 = vpop.eup %1942 }
 0x529   :  { %v1341_v16 = vadd.f32 1.0, %v1943_v6 }
 0x52a   :  { %v1945_v20 = vpop.eup %1944 }
 0x52b   :  { %v1947_v53 = vpop.eup %1946  ;;  %v1235_v54 = vmul.f32 %v1945_v20, %v1233_v31  ;;  %1948 = vrcp.f32 %v1341_v16  ;;  %vm1240_vm14 = vweird.f32 %v1945_v20  ;;  %v1353_v36 = vand.u32 2147483648, %v1341_v16 }
 0x52c   :  { %v1277_v56 = vmul.f32 %v1947_v53, %v1275_v49  ;;  %1950 = vtanh.f32 %v1313_v52  ;;  %vm1282_vm15 = vweird.f32 %v1947_v53  ;;  %vm1241_vm3 = vmor %vm1239_vm0, %vm1240_vm14  ;;  %vm1347_vm8 = vweird.f32 %v1341_v16 }
 0x52d   :  { %v1236_v57 = vsub.f32 1.0, %v1235_v54  ;;  %vm1283_vm4 = vmor %vm1281_vm2, %vm1282_vm15  ;;  %v1351_v37 = vand.u32 2147483647, %v1341_v16  ;;  %v1354_v41 = vor.u32 1.1754944e-38, %v1353_v36 }
 0x52e   :  { %v1278_v58 = vsub.f32 1.0, %v1277_v56 }
 0x52f   :  { %v1237_v61 = vmul.f32 %v1945_v20, %v1236_v57  ;;  %vm1352_vm10 = vcmp.eq.f32.partialorder %v1351_v37, 8.507059e+37  ;;  %v1452_v57 = vld [vmem:[#allocation4 + $0x38] sm:$0xff] }
 0x530   :  { %v1279_v63 = vmul.f32 %v1947_v53, %v1278_v58 }
 0x531   :  { %v1949_v1 = vpop.eup %1948  ;;  %v1238_v2 = vadd.f32 %v1945_v20, %v1237_v61 }
 0x532   :  { %v1280_v5 = vadd.f32 %v1947_v53, %v1279_v63  ;;  %v1343_v7 = vmul.f32 %v1949_v1, %v1341_v16  ;;  %v1951_v18 = vpop.eup %1950  ;;  %vm1348_vm7 = vweird.f32 %v1949_v1 }
 0x533   :  { %v1242_v15 = vsel %vm1241_vm3, %v1945_v20, %v1238_v2  ;;  %vm1349_vm9 = vmor %vm1347_vm8, %vm1348_vm7  ;;  %vm1754_vm8 = vcmask 7168  }
 0x534   :  { %v1247_v19 = vsel %vm1244_vm5, %v1246_v3, %v1242_v15  ;;  %v1284_v22 = vsel %vm1283_vm4, %v1947_v53, %v1280_v5  ;;  %v1344_v27 = vsub.f32 1.0, %v1343_v7 }
 0x535   :  { %v1289_v28 = vsel %vm1286_vm6, %v1288_v14, %v1284_v22  ;;  %v1358_v29 = vmul.f32 %v1951_v18, %v1247_v19 }
 0x536   :  { %v1357_v30 = vmul.f32 %v1289_v28, %v2478_v35  ;;  %v1345_v32 = vmul.f32 %v1949_v1, %v1344_v27  ;;  %v2507_v35 = vld [vmem:[#allocation6] sm:$0xff] }
 0x538   :  { %v2499_v33 = vadd.f32 %v1358_v29, %v1357_v30  ;;  %v1346_v34 = vadd.f32 %v1949_v1, %v1345_v32 }
 0x53a   :  { %1952 = vtanh.f32 %v2499_v33  ;;  %v1350_v39 = vsel %vm1349_vm9, %v1949_v1, %v1346_v34 }
 0x53b   :  { %v1355_v43 = vsel %vm1352_vm10, %v1354_v41, %v1350_v39 }
 0x540   :  { %v1953_v42 = vpop.eup %1952 }
 0x541   :  { %v1361_v44 = vmul.f32 %v1953_v42, %v1355_v43 }
 0x543   :  { %1363 = vst.msk [vmem:[#allocation6 + $0x30] sm:$0xff] %vm120_vm1, %v1361_v44  ;;  %1813 = vmatmul.msk.f32.vlgmr.msra.gmra.mxu0 %vm120_vm1, %v1361_v44  ;;  %1815 = vmatmul.msk.f32.vlgmr.msra.gmra.mxu1 %vm120_vm1, %v1361_v44 }
 0x544   :  { %1817 = vmatmul.msk.f32.vlgmr.msra.gmra.mxu2 %vm120_vm1, %v1361_v44  ;;  %1818 = vmatmul.msk.f32.vlgmr.msra.gmra.mxu3 %vm120_vm1, %v1361_v44 }
 0x54a   :  { %v2531_v38 = vld [vmem:[#allocation6 + $0x30] sm:$0xff] }
 0x54b   :  { %1820 = vmatmul.msk.f32.vlgmr.msrb.gmra.mxu0 %vm120_vm1, %v2507_v35 }
 0x553   :  { %1821 = vmatmul.msk.f32.gmra.mxu0 %vm120_vm1, %v2511_v45 }
 0x55b   :  { %1822 = vmatmul.msk.f32.gmra.mxu0 %vm120_vm1, %v2515_v46 }
 0x563   :  { %1823 = vmatmul.msk.f32.gmra.mxu0 %vm120_vm1, %v2519_v40 }
 0x56b   :  { %1824 = vmatmul.msk.f32.gmra.mxu0 %vm120_vm1, %v2523_v9 }
 0x573   :  { %1825 = vmatmul.msk.f32.gmra.mxu0 %vm120_vm1, %v2527_v10 }
 0x57b   :  { %1826 = vmatmul.msk.f32.gmra.mxu0 %vm120_vm1, %v2531_v38 }
 0x5c0   :  { %v1386_v17 = vpop.f32.mrf.mxu0  ;;  %v1428_v47 = vpop.f32.mrf.mxu1 }
 0x5c1   :  { %v1389_v48 = vadd.f32 %v1386_v17, %v1365_v12  ;;  %v1431_v23 = vadd.f32 %v1428_v47, %v1410_v55 }
 0x5c3   :  { %v1814_v24 = vmul.f32 -1.442695, %v1389_v48  ;;  %v1816_v4 = vmul.f32 -1.442695, %v1431_v23 }
 0x5c5   :  { %1954 = vpow2.f32 %v1814_v24 }
 0x5c6   :  { %1956 = vpow2.f32 %v1816_v4 }
 0x5c7   :  { %v1494_v31 = vpop.f32.mrf.mxu3  ;;  %v1470_v53 = vpop.f32.mrf.mxu2 }
 0x5c8   :  { %v1497_v49 = vadd.f32 %v1494_v31, %v1476_v21  ;;  %v1581_v50 = vpop.f32.mrf.mxu0  ;;  %v1473_v61 = vadd.f32 %v1470_v53, %v1452_v57 }
 0x5c9   :  { %v2541_v25 = vadd.f32 %v2538_v26, %v1581_v50 }
 0x5ca   :  { %v1819_v8 = vmul.f32 -1.442695, %v1497_v49 }
 0x5cb   :  { %v1955_v51 = vpop.eup %1954  ;;  %v1605_v6 = vmax.f32 %v2541_v25, 0.0 }
 0x5cc   :  { %v1957_v13 = vpop.eup %1956  ;;  %v1393_v11 = vadd.f32 1.0, %v1955_v51  ;;  %1958 = vpow2.f32 %v1819_v8 }
 0x5cd   :  { %v1435_v16 = vadd.f32 1.0, %v1957_v13  ;;  %v1613_v20 = vsel %vm120_vm1, %v1605_v6, -inf }
 0x5ce   :  { %1960 = vrcp.f32 %v1393_v11  ;;  %1614 = vmax.xlane.f32.xlu0 %v1613_v20  ;;  %v1403_v5 = vand.u32 2147483647, %v1393_v11  ;;  %v1405_v7 = vand.u32 2147483648, %v1393_v11  ;;  %vm1399_vm13 = vweird.f32 %v1393_v11 }
 0x5cf   :  { %1962 = vrcp.f32 %v1435_v16  ;;  %v1447_v15 = vand.u32 2147483648, %v1435_v16  ;;  %v1445_v27 = vand.u32 2147483647, %v1435_v16  ;;  %vm1441_vm14 = vweird.f32 %v1435_v16 }
 0x5d0   :  { %v1584_v52 = vpop.f32.mrf.mxu0  ;;  %v1406_v32 = vor.u32 1.1754944e-38, %v1405_v7  ;;  %vm1404_vm2 = vcmp.eq.f32.partialorder %v1403_v5, 8.507059e+37 }
 0x5d1   :  { %v2548_v54 = vadd.f32 %v2538_v26, %v1584_v52  ;;  %v1448_v37 = vor.u32 1.1754944e-38, %v1447_v15  ;;  %vm1446_vm3 = vcmp.eq.f32.partialorder %v1445_v27, 8.507059e+37 }
 0x5d2   :  { %v1959_v56 = vpop.eup %1958 }
 0x5d3   :  { %v2550_v58 = vadd.f32 1.0, %v1959_v56  ;;  %v1606_v59 = vmax.f32 %v2548_v54, 0.0 }
 0x5d4   :  { %v1961_v60 = vpop.eup %1960 }
 0x5d5   :  { %v1963_v62 = vpop.eup %1962  ;;  %v1395_v63 = vmul.f32 %v1961_v60, %v1393_v11  ;;  %1964 = vrcp.f32 %v2550_v58  ;;  %v1616_v2 = vsel %vm120_vm1, %v1606_v59, -inf  ;;  %vm1400_vm11 = vweird.f32 %v1961_v60 }
 0x5d6   :  { %v1437_v0 = vmul.f32 %v1963_v62, %v1435_v16  ;;  %1966 = vtanh.f32 %v1473_v61  ;;  %1617 = vmax.xlane.f32.xlu1 %v1616_v2  ;;  %vm1442_vm12 = vweird.f32 %v1963_v62  ;;  %vm1401_vm15 = vmor %vm1399_vm13, %vm1400_vm11  ;;  %v1513_v49 = vand.u32 2147483648, %v2550_v58 }
 0x5d7   :  { %v1396_v1 = vsub.f32 1.0, %v1395_v63  ;;  %vm1443_vm0 = vmor %vm1441_vm14, %vm1442_vm12  ;;  %vm1507_vm5 = vweird.f32 %v2550_v58  ;;  %v1511_v50 = vand.u32 2147483647, %v2550_v58 }
 0x5d8   :  { %v1438_v3 = vsub.f32 1.0, %v1437_v0  ;;  %v1587_v14 = vpop.f32.mrf.mxu0  ;;  %v1514_v51 = vor.u32 1.1754944e-38, %v1513_v49 }
 0x5d9   :  { %v1397_v18 = vmul.f32 %v1961_v60, %v1396_v1  ;;  %v2558_v19 = vadd.f32 %v2538_v26, %v1587_v14  ;;  %vm1512_vm7 = vcmp.eq.f32.partialorder %v1511_v50, 8.507059e+37 }
 0x5da   :  { %v1439_v22 = vmul.f32 %v1963_v62, %v1438_v3 }
 0x5db   :  { %v1965_v28 = vpop.eup %1964  ;;  %v1398_v29 = vadd.f32 %v1961_v60, %v1397_v18  ;;  %v1607_v30 = vmax.f32 %v2558_v19, 0.0 }
 0x5dc   :  { %v1440_v34 = vadd.f32 %v1963_v62, %v1439_v22  ;;  %v1503_v36 = vmul.f32 %v1965_v28, %v2550_v58  ;;  %v1967_v42 = vpop.eup %1966  ;;  %vm1508_vm4 = vweird.f32 %v1965_v28 }
 0x5dd   :  { %v1402_v39 = vsel %vm1401_vm15, %v1961_v60, %v1398_v29  ;;  %v1619_v41 = vsel %vm120_vm1, %v1607_v30, -inf  ;;  %vm1509_vm6 = vmor %vm1507_vm5, %vm1508_vm4 }
 0x5de   :  { %v1407_v43 = vsel %vm1404_vm2, %v1406_v32, %v1402_v39  ;;  %v1444_v44 = vsel %vm1443_vm0, %v1963_v62, %v1440_v34  ;;  %v1504_v12 = vsub.f32 1.0, %v1503_v36  ;;  %1620 = vmax.xlane.f32.xlu2 %v1619_v41 }
 0x5df   :  { %v1449_v17 = vsel %vm1446_vm3, %v1448_v37, %v1444_v44  ;;  %v1518_v55 = vmul.f32 %v1967_v42, %v1407_v43 }
 0x5e0   :  { %v1517_v47 = vmul.f32 %v1449_v17, %v2499_v33  ;;  %v1505_v48 = vmul.f32 %v1965_v28, %v1504_v12  ;;  %v1590_v23 = vpop.f32.mrf.mxu0 }
 0x5e1   :  { %v1591_v24 = vadd.f32 %v2538_v26, %v1590_v23 }
 0x5e2   :  { %v1519_v4 = vadd.f32 %v1518_v55, %v1517_v47  ;;  %v1506_v21 = vadd.f32 %v1965_v28, %v1505_v48 }
 0x5e3   :  { %v1608_v31 = vmax.f32 %v1591_v24, 0.0 }
 0x5e4   :  { %1968 = vtanh.f32 %v1519_v4  ;;  %v1510_v33 = vsel %vm1509_vm6, %v1965_v28, %v1506_v21 }
 0x5e5   :  { %v1622_v8 = vsel %vm120_vm1, %v1608_v31, -inf  ;;  %v1515_v20 = vsel %vm1512_vm7, %v1514_v51, %v1510_v33 }
 0x5e6   :  { %1623 = vmax.xlane.f32.xlu2 %v1622_v8 }
 0x5e8   :  { %v1593_v13 = vpop.f32.mrf.mxu0 }
 0x5e9   :  { %v1594_v11 = vadd.f32 %v2538_v26, %v1593_v13 }
 0x5ea   :  { %v1969_v16 = vpop.eup %1968 }
 0x5eb   :  { %v1521_v52 = vmul.f32 %v1969_v16, %v1515_v20  ;;  %v1609_v53 = vmax.f32 %v1594_v11, 0.0 }
 0x5ed   :  { %1523 = vst.msk [vmem:[#allocation6 + $0x38] sm:$0xff] %vm120_vm1, %v1521_v52  ;;  %v1625_v56 = vsel %vm120_vm1, %v1609_v53, -inf }
 0x5ee   :  { %1626 = vmax.xlane.f32.xlu0 %v1625_v56 }
 0x5f0   :  { %v1596_v57 = vpop.f32.mrf.mxu0 }
 0x5f1   :  { %v1597_v58 = vadd.f32 %v2538_v26, %v1596_v57 }
 0x5f3   :  { %v1610_v60 = vmax.f32 %v1597_v58, 0.0 }
 0x5f4   :  { %v2575_v61 = vld [vmem:[#allocation6 + $0x38] sm:$0xff] }
 0x5f5   :  { %1827 = vmatmul.msk.f32.gmra.mxu0 %vm120_vm1, %v2575_v61  ;;  %v1628_v62 = vsel %vm120_vm1, %v1610_v60, -inf }
 0x5f6   :  { %1629 = vmax.xlane.f32.xlu1 %v1628_v62 }
 0x5f8   :  { %v1599_v63 = vpop.f32.mrf.mxu0 }
 0x5f9   :  { %v1600_v0 = vadd.f32 %v2538_v26, %v1599_v63 }
 0x5fb   :  { %v1611_v1 = vmax.f32 %v1600_v0, 0.0 }
 0x5fd   :  { %v1631_v2 = vsel %vm120_vm1, %v1611_v1, -inf }
 0x5fe   :  { %1632 = vmax.xlane.f32.xlu2 %v1631_v2 }
 0x641   :  { %v1615_v3 = vpop.xlane.xlu0 %1614 }
 0x642   :  { %v1637_v5 = vsub.f32 %v1605_v6, %v1615_v3 }
 0x644   :  { %v1645_v7 = vmul.f32 1.442695, %v1637_v5 }
 0x646   :  { %1970 = vpow2.f32 %v1645_v7 }
 0x649   :  { %v1618_v14 = vpop.xlane.xlu1 %1617 }
 0x64a   :  { %v1638_v18 = vsub.f32 %v1606_v59, %v1618_v14 }
 0x64c   :  { %v2584_v15 = vpop.eup %1970  ;;  %v1647_v27 = vmul.f32 1.442695, %v1638_v18 }
 0x64d   :  { %v1661_v22 = vsel %vm120_vm1, %v2584_v15, 0.0 }
 0x64e   :  { %1662 = vadd.xlane.f32.xlu1 %v1661_v22  ;;  %1972 = vpow2.f32 %v1647_v27 }
 0x651   :  { %v1621_v28 = vpop.xlane.xlu2 %1620 }
 0x652   :  { %v1639_v42 = vsub.f32 %v1607_v30, %v1621_v28 }
 0x654   :  { %v2590_v29 = vpop.eup %1972  ;;  %v1649_v44 = vmul.f32 1.442695, %v1639_v42 }
 0x655   :  { %v1664_v25 = vsel %vm120_vm1, %v2590_v29, 0.0 }
 0x656   :  { %1665 = vadd.xlane.f32.xlu2 %v1664_v25 }
 0x659   :  { %v1624_v6 = vpop.xlane.xlu2 %1623 }
 0x65a   :  { %v1640_v32 = vsub.f32 %v1608_v31, %v1624_v6 }
 0x65c   :  { %v1651_v34 = vmul.f32 1.442695, %v1640_v32 }
 0x65e   :  { %1974 = vpow2.f32 %v1651_v34 }
 0x661   :  { %v1627_v36 = vpop.xlane.xlu0 %1626 }
 0x662   :  { %v1641_v54 = vsub.f32 %v1609_v53, %v1627_v36 }
 0x664   :  { %v2594_v59 = vpop.eup %1974  ;;  %v1653_v37 = vmul.f32 1.442695, %v1641_v54 }
 0x665   :  { %v1670_v39 = vsel %vm120_vm1, %v2594_v59, 0.0 }
 0x666   :  { %1976 = vpow2.f32 %v1653_v37  ;;  %1671 = vadd.xlane.f32.xlu1 %v1670_v39  ;;  %v16_v39 = vstv %s2654_s10 }
 0x667   :  { %1978 = vpow2.f32 %v1649_v44  ;;  %17 = vst [vmem:[#allocation7] sm:$0x1] %v16_v39 }
 0x669   :  { %v1630_v47 = vpop.xlane.xlu1 %1629 }
 0x66a   :  { %v1642_v4 = vsub.f32 %v1610_v60, %v1630_v47 }
 0x66c   :  { %v2598_v41 = vpop.eup %1976  ;;  %v1655_v19 = vmul.f32 1.442695, %v1642_v4 }
 0x66d   :  { %v1673_v43 = vsel %vm120_vm1, %v2598_v41, 0.0  ;;  %v1979_v30 = vpop.eup %1978 }
 0x66e   :  { %1674 = vadd.xlane.f32.xlu2 %v1673_v43  ;;  %v1667_v50 = vsel %vm120_vm1, %v1979_v30, 0.0 }
 0x671   :  { %v1633_v12 = vpop.xlane.xlu2 %1632 }
 0x672   :  { %v1602_v17 = vpop.f32.mrf.mxu0  ;;  %v1643_v55 = vsub.f32 %v1611_v1, %v1633_v12 }
 0x673   :  { %v1603_v48 = vadd.f32 %v2538_v26, %v1602_v17 }
 0x674   :  { %v1657_v23 = vmul.f32 1.442695, %v1643_v55 }
 0x675   :  { %v1612_v24 = vmax.f32 %v1603_v48, 0.0 }
 0x676   :  { %1980 = vpow2.f32 %v1657_v23 }
 0x677   :  { %v1634_v21 = vsel %vm120_vm1, %v1612_v24, -inf  ;;  %1982 = vpow2.f32 %v1655_v19 }
 0x678   :  { %1635 = vmax.xlane.f32.xlu0 %v1634_v21 }
 0x67c   :  { %v2606_v31 = vpop.eup %1980 }
 0x67d   :  { %v1679_v49 = vsel %vm120_vm1, %v2606_v31, 0.0  ;;  %v2611_v26 = vpop.eup %1982 }
 0x67e   :  { %1680 = vadd.xlane.f32.xlu1 %v1679_v49  ;;  %v1676_v8 = vsel %vm120_vm1, %v2611_v26, 0.0 }
 0x680   :  { %1668 = vadd.xlane.f32.xlu0 %v1667_v50 }
 0x688   :  { %1677 = vadd.xlane.f32.xlu0 %v1676_v8 }
 0x6c1   :  { %v1663_v20 = vpop.xlane.xlu1 %1662 }
 0x6c9   :  { %v1666_v52 = vpop.xlane.xlu2 %1665 }
 0x6d9   :  { %v1672_v56 = vpop.xlane.xlu1 %1671 }
 0x6e1   :  { %v1675_v62 = vpop.xlane.xlu2 %1674 }
 0x6eb   :  { %v1636_v33 = vpop.xlane.xlu0 %1635 }
 0x6ec   :  { %v1644_v51 = vsub.f32 %v1612_v24, %v1636_v33 }
 0x6ee   :  { %v1659_v13 = vmul.f32 1.442695, %v1644_v51 }
 0x6f0   :  { %1984 = vpow2.f32 %v1659_v13 }
 0x6f1   :  { %1986 = vrcp.f32 %v1666_v52  ;;  %v1681_v14 = vpop.xlane.xlu1 %1680 }
 0x6f2   :  { %1988 = vrcp.f32 %v1663_v20 }
 0x6f3   :  { %v1669_v53 = vpop.xlane.xlu0 %1668 }
 0x6f4   :  { %1990 = vrcp.f32 %v1669_v53 }
 0x6f5   :  { %1992 = vrcp.f32 %v1672_v56 }
 0x6f6   :  { %v2615_v11 = vpop.eup %1984  ;;  %1994 = vrcp.f32 %v1675_v62 }
 0x6f7   :  { %v1682_v16 = vsel %vm120_vm1, %v2615_v11, 0.0  ;;  %v1987_v57 = vpop.eup %1986 }
 0x6f8   :  { %1683 = vadd.xlane.f32.xlu2 %v1682_v16  ;;  %v1989_v58 = vpop.eup %1988  ;;  %v1694_v63 = vmul.f32 %v1987_v57, %v1666_v52 }
 0x6f9   :  { %v1693_v1 = vmul.f32 %v1989_v58, %v1663_v20 }
 0x6fa   :  { %v1991_v60 = vpop.eup %1990  ;;  %v1702_v3 = vsub.f32 2.0, %v1694_v63 }
 0x6fb   :  { %v1678_v0 = vpop.xlane.xlu0 %1677  ;;  %v1695_v2 = vmul.f32 %v1991_v60, %v1669_v53  ;;  %v1993_v5 = vpop.eup %1992  ;;  %v1701_v7 = vsub.f32 2.0, %v1693_v1 }
 0x6fc   :  { %1996 = vrcp.f32 %v1678_v0  ;;  %v1995_v22 = vpop.eup %1994  ;;  %v1710_v27 = vmul.f32 %v1987_v57, %v1702_v3  ;;  %v1696_v28 = vmul.f32 %v1993_v5, %v1672_v56 }
 0x6fd   :  { %v1703_v18 = vsub.f32 2.0, %v1695_v2  ;;  %1998 = vrcp.f32 %v1681_v14  ;;  %v1709_v6 = vmul.f32 %v1989_v58, %v1701_v7  ;;  %v1697_v54 = vmul.f32 %v1995_v22, %v1675_v62  ;;  %v1841_v62 = vld [vmem:[#allocation7] ss:$0 sm:$0xff] }
 0x6fe   :  { %v1718_v34 = vmul.f32 %v2590_v29, %v1710_v27  ;;  %v1704_v36 = vsub.f32 2.0, %v1696_v28 }
 0x6ff   :  { %v1711_v32 = vmul.f32 %v1991_v60, %v1703_v18  ;;  %v1717_v42 = vmul.f32 %v2584_v15, %v1709_v6  ;;  %v1705_v55 = vsub.f32 2.0, %v1697_v54 }
 0x700   :  { %v1726_v12 = vmul.f32 %v1718_v34, %v2511_v45  ;;  %v1712_v17 = vmul.f32 %v1993_v5, %v1704_v36 }
 0x701   :  { %v1719_v43 = vmul.f32 %v1979_v30, %v1711_v32  ;;  %v1725_v48 = vmul.f32 %v1717_v42, %v2507_v35  ;;  %v1713_v21 = vmul.f32 %v1995_v22, %v1705_v55 }
 0x702   :  { %v1997_v25 = vpop.eup %1996  ;;  %v1720_v4 = vmul.f32 %v2594_v59, %v1712_v17 }
 0x703   :  { %v1698_v37 = vmul.f32 %v1997_v25, %v1678_v0  ;;  %v1999_v44 = vpop.eup %1998  ;;  %v1727_v23 = vmul.f32 %v1719_v43, %v2515_v46  ;;  %v1733_v24 = vadd.f32 %v1726_v12, %v1725_v48  ;;  %v1721_v45 = vmul.f32 %v2598_v41, %v1713_v21 }
 0x704   :  { %v1699_v29 = vmul.f32 %v1999_v44, %v1681_v14  ;;  %v1728_v50 = vmul.f32 %v1720_v4, %v2519_v40 }
 0x705   :  { %v1706_v47 = vsub.f32 2.0, %v1698_v37  ;;  %v1734_v30 = vadd.f32 %v1733_v24, %v1727_v23  ;;  %v1729_v46 = vmul.f32 %v1721_v45, %v2523_v9  ;;  %v1840_v9 = vld [vmem:[%s2653_s9] ss:$0 sm:$0xff] }
 0x706   :  { %v1707_v15 = vsub.f32 2.0, %v1699_v29 }
 0x707   :  { %v1714_v19 = vmul.f32 %v1997_v25, %v1706_v47  ;;  %v1735_v35 = vadd.f32 %v1734_v30, %v1728_v50 }
 0x708   :  { %v1715_v33 = vmul.f32 %v1999_v44, %v1707_v15 }
 0x709   :  { %v1722_v8 = vmul.f32 %v2611_v26, %v1714_v19  ;;  %v1736_v52 = vadd.f32 %v1735_v35, %v1729_v46 }
 0x70a   :  { %v1723_v16 = vmul.f32 %v2606_v31, %v1715_v33 }
 0x70b   :  { %v1730_v13 = vmul.f32 %v1722_v8, %v2527_v10 }
 0x70c   :  { %v1731_v40 = vmul.f32 %v1723_v16, %v2531_v38 }
 0x70d   :  { %v1737_v56 = vadd.f32 %v1736_v52, %v1730_v13 }
 0x70f   :  { %v1738_v57 = vadd.f32 %v1737_v56, %v1731_v40 }
 0x76b   :  { %v1684_v49 = vpop.xlane.xlu2 %1683 }
 0x76c   :  { %2000 = vrcp.f32 %v1684_v49 }
 0x772   :  { %v2001_v51 = vpop.eup %2000 }
 0x773   :  { %v1700_v59 = vmul.f32 %v2001_v51, %v1684_v49 }
 0x775   :  { %v1708_v20 = vsub.f32 2.0, %v1700_v59 }
 0x777   :  { %v1716_v53 = vmul.f32 %v2001_v51, %v1708_v20 }
 0x779   :  { %v1724_v41 = vmul.f32 %v2615_v11, %v1716_v53 }
 0x77b   :  { %v1732_v26 = vmul.f32 %v1724_v41, %v2575_v61 }
 0x77d   :  { %v1739_v58 = vadd.f32 %v1738_v57, %v1732_v26 }
 0x77f   :  { %v1740_v10 = vmax.f32 %v1739_v58, 0.0 }
 0x781   :  { %v1745_v60 = vmul.f32 %v1840_v9, %v1740_v10 }
 0x783   :  { %v1746_v31 = vsel %vm120_vm1, %v1745_v60, 0.0 }
 0x784   :  { %1747 = vadd.xlane.f32.xlu0 %v1746_v31 }
 0x7f7   :  { %v1748_v63 = vpop.xlane.xlu0 %1747 }
 0x7f8   :  { %v1753_v0 = vadd.f32 %v1841_v62, %v1748_v63 }
 0x7fa   :  { %1755 = vst.msk [vmem:[%s2655_s11] sm:$0xff] %vm1754_vm8, %v1753_v0 }

</bundles_post_ra>
